<compile_context>
chip_gen: v5e
topology: v5e:2x2
jax: 0.10.0
libtpu: 0.0.40
codegen_flags: <defaults>
</compile_context>

<pallas_src>
import functools

import jax
import jax.numpy as jnp
from jax.experimental import pallas as pl
from jax.experimental.pallas import tpu as pltpu

CKPT_EMBEDDING_DIM = 256
CKPT_HIDDEN_SIZE = 128
CKPT_VOCABULARY_SIZE = 82
PADDING_TOKEN = 0


def _lstm_seq_kernel(
    xproj_ref,   # (TILE_T, B, 3H) f32  hoisted input projections for this chunk
    wh_ref,      # (H, 3H)        bf16  fused h-side gate weights [f | o | c]
    f_ref,       # (TILE_T, B, H) f32   out: forget gate per step
    o_ref,       # (TILE_T, B, H) f32   out: output gate per step
    ct_ref,      # (TILE_T, B, H) f32   out: cell candidate per step
    hfin_ref,    # (B, H)         f32   out: final hidden state (resident block)
    h_sc,        # (B, H)         f32   VMEM scratch: hidden state across chunks
    c_sc,        # (B, H)         f32   VMEM scratch: cell state across chunks
):
  H = h_sc.shape[-1]
  tile_t = xproj_ref.shape[0]

  @pl.when(pl.program_id(0) == 0)
  def _():
    h_sc[...] = jnp.zeros_like(h_sc)
    c_sc[...] = jnp.zeros_like(c_sc)

  wh = wh_ref[...]          # load fused weights once per chunk
  h = h_sc[...]
  c = c_sc[...]

  # Statically unrolled recurrence over the chunk (TILE_T is small and static).
  for i in range(tile_t):
    # single fused h-projection: (B, H) @ (H, 3H) on the MXU, f32 accumulation
    pre = (jnp.dot(h.astype(wh.dtype), wh, preferred_element_type=jnp.float32)
           + xproj_ref[i])
    f = jax.nn.sigmoid(pre[:, 0:H])
    o = jax.nn.sigmoid(pre[:, H:2 * H])
    c_tilde = jnp.tanh(pre[:, 2 * H:3 * H])

    c = c_tilde + f * (c - c_tilde)        # == f*c + (1-f)*c_tilde
    h = o * jnp.tanh(c)

    f_ref[i] = f.astype(f_ref.dtype)
    o_ref[i] = o.astype(o_ref.dtype)
    ct_ref[i] = c_tilde.astype(ct_ref.dtype)

  h_sc[...] = h
  c_sc[...] = c
  # Constant-index output block is VMEM-resident across the grid: the write from
  # the last grid step is what lands in HBM.
  hfin_ref[...] = h.astype(hfin_ref.dtype)


def coupled_lstm_forward(data_tbe, w_f, w_c, w_o, *,
                         tile_t=None, compute_dtype=jnp.bfloat16):
  """data_tbe: (T, B, E) float32 time-major embedded inputs.
  w_*: (H, H+E) torch-layout gate weights.
  Returns (f_seq, o_seq, ct_seq, h_final)."""
  T, B, E = data_tbe.shape
  H = CKPT_HIDDEN_SIZE

  if tile_t is None:  # largest divisor of T not exceeding 32
    tile_t = next(t for t in range(min(T, 32), 0, -1) if T % t == 0)
  assert T % tile_t == 0, (T, tile_t)

  # F.linear(concat([h, x]), W) == h @ W[:, :H].T + x @ W[:, H:].T
  def h_part(w):
    return jnp.transpose(w[:, :H])           # (H, H)

  def x_part(w):
    return jnp.transpose(w[:, H:])            # (E, H)

  # Fuse gates along the output dim in the fixed order [f, o, c].
  wh = jnp.concatenate([h_part(w_f), h_part(w_o), h_part(w_c)], axis=1)  # (H, 3H)
  wx = jnp.concatenate([x_part(w_f), x_part(w_o), x_part(w_c)], axis=1)  # (E, 3H)

  # Hoisted, time-parallel input projection: one big (T*B, E) @ (E, 3H) matmul
  # (bf16 operands, f32 accumulation). This is ~2/3 of the total FLOPs and fills
  # the MXU far better than per-step (B, E) matmuls inside the recurrence.
  xproj = jnp.dot(
      data_tbe.reshape(T * B, E).astype(compute_dtype),
      wx.astype(compute_dtype),
      preferred_element_type=jnp.float32,
  ).reshape(T, B, 3 * H)

  wh = wh.astype(compute_dtype)

  grid = (T // tile_t,)

  out_shapes = (
      jax.ShapeDtypeStruct((T, B, H), jnp.float32),   # f per step
      jax.ShapeDtypeStruct((T, B, H), jnp.float32),   # o per step
      jax.ShapeDtypeStruct((T, B, H), jnp.float32),   # c_tilde per step
      jax.ShapeDtypeStruct((B, H), jnp.float32),      # final hidden state
  )

  grid_spec = pltpu.PrefetchScalarGridSpec(
      num_scalar_prefetch=0,
      grid=grid,
      in_specs=[
          pl.BlockSpec((tile_t, B, 3 * H), lambda t: (t, 0, 0)),   # xproj chunk
          pl.BlockSpec((H, 3 * H), lambda t: (0, 0)),              # fused W_h
      ],
      out_specs=[
          pl.BlockSpec((tile_t, B, H), lambda t: (t, 0, 0)),
          pl.BlockSpec((tile_t, B, H), lambda t: (t, 0, 0)),
          pl.BlockSpec((tile_t, B, H), lambda t: (t, 0, 0)),
          pl.BlockSpec((B, H), lambda t: (0, 0)),
      ],
      scratch_shapes=[
          pltpu.VMEM((B, H), jnp.float32),   # h state (f32 across chunks)
          pltpu.VMEM((B, H), jnp.float32),   # c state
      ],
  )

  f_seq, o_seq, ct_seq, h_final = pl.pallas_call(
      _lstm_seq_kernel,
      out_shape=out_shapes,
      grid_spec=grid_spec,
      compiler_params=pltpu.CompilerParams(
          dimension_semantics=("arbitrary",)),   # recurrence is strictly serial
  )(xproj, wh)

  return f_seq, o_seq, ct_seq, h_final


def init_params(key):
  """Deterministic synthetic parameters matching the PyTorch module shapes."""
  V, E, H = CKPT_VOCABULARY_SIZE, CKPT_EMBEDDING_DIM, CKPT_HIDDEN_SIZE
  keys = jax.random.split(key, 6)

  # nn.Embedding default: N(0, 1), padding row zeroed.
  emb = jax.random.normal(keys[0], (V, E), jnp.float32)
  emb = emb.at[PADDING_TOKEN].set(0.0)

  # VisualizeCoupledLSTMCell.reset_parameters: U(-sqrt_k, sqrt_k), sqrt_k=1/sqrt(H)
  sqrt_k = (1.0 / H) ** 0.5
  w_f = jax.random.uniform(keys[1], (H, H + E), jnp.float32, -sqrt_k, sqrt_k)
  w_c = jax.random.uniform(keys[2], (H, H + E), jnp.float32, -sqrt_k, sqrt_k)
  w_o = jax.random.uniform(keys[3], (H, H + E), jnp.float32, -sqrt_k, sqrt_k)

  # nn.Linear default: U(-1/sqrt(H), 1/sqrt(H)) for weight and bias.
  bound = (1.0 / H) ** 0.5
  cls_w = jax.random.uniform(keys[4], (V, H), jnp.float32, -bound, bound)
  cls_b = jax.random.uniform(keys[5], (V,), jnp.float32, -bound, bound)

  return dict(embedding=emb, w_f=w_f, w_c=w_c, w_o=w_o,
              cls_w=cls_w, cls_b=cls_b)


@functools.partial(jax.jit, static_argnames=("tile_t",))
def visualize_internal_gates(batch_reviews, params, tile_t=None):
  """batch_reviews: (B, T) int32 token ids. Returns (logits, gate-outputs dict)."""
  # Gather the embedding directly in time-major order (no (T,B,E) transpose copy).
  data = jnp.take(params["embedding"], batch_reviews.T, axis=0)   # (T, B, E)
  f_seq, o_seq, ct_seq, h_final = coupled_lstm_forward(
      data, params["w_f"], params["w_c"], params["w_o"], tile_t=tile_t)
  # One-off classifier on the final hidden state: plain JAX/XLA, outside the kernel.
  logits = jnp.dot(h_final, params["cls_w"].T,
                   preferred_element_type=jnp.float32) + params["cls_b"]
  outputs = {
      "update_signals": f_seq,          # (T, B, H): gate f, one slice per step
      "reset_signals": o_seq,           # (T, B, H): gate o
      "cell_state_candidates": ct_seq,  # (T, B, H): c_tilde
  }
  return logits, outputs


def _reference(batch_reviews, params):
  """Pure-JAX (f32) reference of the PyTorch forward for a correctness check."""
  H = CKPT_HIDDEN_SIZE
  data = jnp.take(params["embedding"], batch_reviews, axis=0)   # (B, T, E)
  B, T, _ = data.shape
  h = jnp.zeros((B, H), jnp.float32)
  c = jnp.zeros((B, H), jnp.float32)
  fs, os_, cts = [], [], []
  for t in range(T):
    x = data[:, t, :]
    cx = jnp.concatenate([h, x], axis=1)
    f = jax.nn.sigmoid(cx @ params["w_f"].T)
    o = jax.nn.sigmoid(cx @ params["w_o"].T)
    ct = jnp.tanh(cx @ params["w_c"].T)
    c = f * c + (1.0 - f) * ct
    h = o * jnp.tanh(c)
    fs.append(f); os_.append(o); cts.append(ct)
  logits = h @ params["cls_w"].T + params["cls_b"]
  return logits, jnp.stack(fs), jnp.stack(os_), jnp.stack(cts)


if __name__ == "__main__":
  key = jax.random.PRNGKey(0)
  pkey, tkey = jax.random.split(key)
  params = init_params(pkey)

  B, T = 8, 32
  batch_reviews = jax.random.randint(tkey, (B, T), 0, CKPT_VOCABULARY_SIZE,
                                     dtype=jnp.int32)

  # tile_t=8 -> grid=(4,) so the cross-chunk h/c carry is exercised.
  logits, outputs = visualize_internal_gates(batch_reviews, params, tile_t=8)
  jax.block_until_ready((logits, outputs))

  # Correctness check against a pure-JAX f32 reference (tolerance loosened per
  # the review since the matmuls use bf16 operands with f32 accumulation).
  ref_logits, ref_f, ref_o, ref_ct = _reference(batch_reviews, params)
  assert jnp.allclose(logits, ref_logits, atol=3e-2, rtol=3e-2)
  assert jnp.allclose(outputs["update_signals"], ref_f, atol=3e-2, rtol=3e-2)
  assert jnp.allclose(outputs["reset_signals"], ref_o, atol=3e-2, rtol=3e-2)
  assert jnp.allclose(outputs["cell_state_candidates"], ref_ct, atol=3e-2, rtol=3e-2)

  print("KERNEL_OK")
</pallas_src>

<mosaic_0001>
module attributes {stable_mosaic.version = 11 : i64} {
  func.func @_lstm_seq_kernel(%arg0: i32, %arg1: memref<8x8x384xf32, #tpu.memory_space<vmem>>, %arg2: memref<128x384xbf16, #tpu.memory_space<vmem>>, %arg3: memref<8x8x128xf32, #tpu.memory_space<vmem>>, %arg4: memref<8x8x128xf32, #tpu.memory_space<vmem>>, %arg5: memref<8x8x128xf32, #tpu.memory_space<vmem>>, %arg6: memref<8x128xf32, #tpu.memory_space<vmem>>, %arg7: memref<8x128xf32, #tpu.memory_space<vmem>>, %arg8: memref<8x128xf32, #tpu.memory_space<vmem>>) attributes {dimension_semantics = [#tpu.dimension_semantics<arbitrary>], iteration_bounds = array<i64: 4>, scalar_prefetch = 0 : i64, scratch_operands = 2 : i64, tpu.core_type = #tpu.core_type<tc>, window_params = [{transform_indices = @transform_0, window_bounds = array<i64: 8, 8, 384>}, {pipeline_mode = #tpu.pipeline_mode<synchronous>, transform_indices = @transform_1, window_bounds = array<i64: 128, 384>}, {transform_indices = @transform_2, window_bounds = array<i64: 8, 8, 128>}, {transform_indices = @transform_3, window_bounds = array<i64: 8, 8, 128>}, {transform_indices = @transform_4, window_bounds = array<i64: 8, 8, 128>}, {pipeline_mode = #tpu.pipeline_mode<synchronous>, transform_indices = @transform_5, window_bounds = array<i64: 8, 128>}]} {
    %c0_i32 = arith.constant 0 : i32
    %0 = arith.cmpi eq, %arg0, %c0_i32 : i32
    %1 = arith.extui %0 : i1 to i32
    %c0_i32_0 = arith.constant 0 : i32
    %2 = arith.cmpi ne, %1, %c0_i32_0 : i32
    scf.if %2 {
      %cst_124 = arith.constant 0.000000e+00 : f32
      %273 = vector.broadcast %cst_124 : f32 to vector<8x128xf32>
      %c0_125 = arith.constant 0 : index
      %c0_126 = arith.constant 0 : index
      %274 = vector.load %arg7[%c0_125, %c0_126] : memref<8x128xf32, #tpu.memory_space<vmem>>, vector<8x128xf32>
      tpu.vector_store %arg7[%c0_125, %c0_126], %273 {strides = array<i32>} : memref<8x128xf32, #tpu.memory_space<vmem>>, vector<8x128xf32>,
      %cst_127 = arith.constant 0.000000e+00 : f32
      %275 = vector.broadcast %cst_127 : f32 to vector<8x128xf32>
      %c0_128 = arith.constant 0 : index
      %c0_129 = arith.constant 0 : index
      %276 = vector.load %arg8[%c0_128, %c0_129] : memref<8x128xf32, #tpu.memory_space<vmem>>, vector<8x128xf32>
      tpu.vector_store %arg8[%c0_128, %c0_129], %275 {strides = array<i32>} : memref<8x128xf32, #tpu.memory_space<vmem>>, vector<8x128xf32>,
    } else {
    }
    %c0 = arith.constant 0 : index
    %c0_1 = arith.constant 0 : index
    %3 = vector.load %arg2[%c0, %c0_1] : memref<128x384xbf16, #tpu.memory_space<vmem>>, vector<128x384xbf16>
    %c0_2 = arith.constant 0 : index
    %c0_3 = arith.constant 0 : index
    %4 = vector.load %arg7[%c0_2, %c0_3] : memref<8x128xf32, #tpu.memory_space<vmem>>, vector<8x128xf32>
    %c0_4 = arith.constant 0 : index
    %c0_5 = arith.constant 0 : index
    %5 = vector.load %arg8[%c0_4, %c0_5] : memref<8x128xf32, #tpu.memory_space<vmem>>, vector<8x128xf32>
    %6 = arith.truncf %4 : vector<8x128xf32> to vector<8x128xbf16>
    %cst = arith.constant dense<0.000000e+00> : vector<8x384xf32>
    %7 = tpu.matmul %6, %3, %cst {dimension_numbers = #tpu.dot_dimension_numbers<[1], [0], [0], [1], [0, 0, 1, 1], [], []>} : vector<8x128xbf16>, vector<128x384xbf16>, vector<8x384xf32> -> vector<8x384xf32>
    %c0_6 = arith.constant 0 : index
    %c0_7 = arith.constant 0 : index
    %c0_8 = arith.constant 0 : index
    %8 = vector.load %arg1[%c0_6, %c0_7, %c0_8] : memref<8x8x384xf32, #tpu.memory_space<vmem>>, vector<1x8x384xf32>
    %9 = vector.shape_cast %8 : vector<1x8x384xf32> to vector<8x384xf32>
    %10 = arith.addf %7, %9 : vector<8x384xf32>
    %11 = vector.extract_strided_slice %10 {offsets = [0, 0], sizes = [8, 128], strides = [1, 1]} : vector<8x384xf32> to vector<8x128xf32>
    %12 = arith.negf %11 : vector<8x128xf32>
    %13 = math.exp %12 : vector<8x128xf32>
    %cst_9 = arith.constant 1.000000e+00 : f32
    %14 = vector.broadcast %cst_9 : f32 to vector<8x128xf32>
    %15 = arith.addf %14, %13 : vector<8x128xf32>
    %16 = arith.divf %14, %15 : vector<8x128xf32>
    %17 = vector.extract_strided_slice %10 {offsets = [0, 128], sizes = [8, 128], strides = [1, 1]} : vector<8x384xf32> to vector<8x128xf32>
    %18 = arith.negf %17 : vector<8x128xf32>
    %19 = math.exp %18 : vector<8x128xf32>
    %cst_10 = arith.constant 1.000000e+00 : f32
    %20 = vector.broadcast %cst_10 : f32 to vector<8x128xf32>
    %21 = arith.addf %20, %19 : vector<8x128xf32>
    %22 = arith.divf %20, %21 : vector<8x128xf32>
    %23 = vector.extract_strided_slice %10 {offsets = [0, 256], sizes = [8, 128], strides = [1, 1]} : vector<8x384xf32> to vector<8x128xf32>
    %24 = math.tanh %23 : vector<8x128xf32>
    %25 = arith.subf %5, %24 : vector<8x128xf32>
    %26 = arith.mulf %16, %25 : vector<8x128xf32>
    %27 = arith.addf %24, %26 : vector<8x128xf32>
    %28 = math.tanh %27 : vector<8x128xf32>
    %29 = arith.mulf %22, %28 : vector<8x128xf32>
    %c0_11 = arith.constant 0 : index
    %c0_12 = arith.constant 0 : index
    %c0_13 = arith.constant 0 : index
    %30 = vector.load %arg3[%c0_11, %c0_12, %c0_13] : memref<8x8x128xf32, #tpu.memory_space<vmem>>, vector<1x8x128xf32>
    %31 = vector.shape_cast %30 : vector<1x8x128xf32> to vector<8x128xf32>
    %32 = vector.shape_cast %16 : vector<8x128xf32> to vector<1x8x128xf32>
    tpu.vector_store %arg3[%c0_11, %c0_12, %c0_13], %32 {strides = array<i32>} : memref<8x8x128xf32, #tpu.memory_space<vmem>>, vector<1x8x128xf32>,
    %c0_14 = arith.constant 0 : index
    %c0_15 = arith.constant 0 : index
    %c0_16 = arith.constant 0 : index
    %33 = vector.load %arg4[%c0_14, %c0_15, %c0_16] : memref<8x8x128xf32, #tpu.memory_space<vmem>>, vector<1x8x128xf32>
    %34 = vector.shape_cast %33 : vector<1x8x128xf32> to vector<8x128xf32>
    %35 = vector.shape_cast %22 : vector<8x128xf32> to vector<1x8x128xf32>
    tpu.vector_store %arg4[%c0_14, %c0_15, %c0_16], %35 {strides = array<i32>} : memref<8x8x128xf32, #tpu.memory_space<vmem>>, vector<1x8x128xf32>,
    %c0_17 = arith.constant 0 : index
    %c0_18 = arith.constant 0 : index
    %c0_19 = arith.constant 0 : index
    %36 = vector.load %arg5[%c0_17, %c0_18, %c0_19] : memref<8x8x128xf32, #tpu.memory_space<vmem>>, vector<1x8x128xf32>
    %37 = vector.shape_cast %36 : vector<1x8x128xf32> to vector<8x128xf32>
    %38 = vector.shape_cast %24 : vector<8x128xf32> to vector<1x8x128xf32>
    tpu.vector_store %arg5[%c0_17, %c0_18, %c0_19], %38 {strides = array<i32>} : memref<8x8x128xf32, #tpu.memory_space<vmem>>, vector<1x8x128xf32>,
    %39 = arith.truncf %29 : vector<8x128xf32> to vector<8x128xbf16>
    %cst_20 = arith.constant dense<0.000000e+00> : vector<8x384xf32>
    %40 = tpu.matmul %39, %3, %cst_20 {dimension_numbers = #tpu.dot_dimension_numbers<[1], [0], [0], [1], [0, 0, 1, 1], [], []>} : vector<8x128xbf16>, vector<128x384xbf16>, vector<8x384xf32> -> vector<8x384xf32>
    %c1 = arith.constant 1 : index
    %c0_21 = arith.constant 0 : index
    %c0_22 = arith.constant 0 : index
    %41 = vector.load %arg1[%c1, %c0_21, %c0_22] : memref<8x8x384xf32, #tpu.memory_space<vmem>>, vector<1x8x384xf32>
    %42 = vector.shape_cast %41 : vector<1x8x384xf32> to vector<8x384xf32>
    %43 = arith.addf %40, %42 : vector<8x384xf32>
    %44 = vector.extract_strided_slice %43 {offsets = [0, 0], sizes = [8, 128], strides = [1, 1]} : vector<8x384xf32> to vector<8x128xf32>
    %45 = arith.negf %44 : vector<8x128xf32>
    %46 = math.exp %45 : vector<8x128xf32>
    %cst_23 = arith.constant 1.000000e+00 : f32
    %47 = vector.broadcast %cst_23 : f32 to vector<8x128xf32>
    %48 = arith.addf %47, %46 : vector<8x128xf32>
    %49 = arith.divf %47, %48 : vector<8x128xf32>
    %50 = vector.extract_strided_slice %43 {offsets = [0, 128], sizes = [8, 128], strides = [1, 1]} : vector<8x384xf32> to vector<8x128xf32>
    %51 = arith.negf %50 : vector<8x128xf32>
    %52 = math.exp %51 : vector<8x128xf32>
    %cst_24 = arith.constant 1.000000e+00 : f32
    %53 = vector.broadcast %cst_24 : f32 to vector<8x128xf32>
    %54 = arith.addf %53, %52 : vector<8x128xf32>
    %55 = arith.divf %53, %54 : vector<8x128xf32>
    %56 = vector.extract_strided_slice %43 {offsets = [0, 256], sizes = [8, 128], strides = [1, 1]} : vector<8x384xf32> to vector<8x128xf32>
    %57 = math.tanh %56 : vector<8x128xf32>
    %58 = arith.subf %27, %57 : vector<8x128xf32>
    %59 = arith.mulf %49, %58 : vector<8x128xf32>
    %60 = arith.addf %57, %59 : vector<8x128xf32>
    %61 = math.tanh %60 : vector<8x128xf32>
    %62 = arith.mulf %55, %61 : vector<8x128xf32>
    %c1_25 = arith.constant 1 : index
    %c0_26 = arith.constant 0 : index
    %c0_27 = arith.constant 0 : index
    %63 = vector.load %arg3[%c1_25, %c0_26, %c0_27] : memref<8x8x128xf32, #tpu.memory_space<vmem>>, vector<1x8x128xf32>
    %64 = vector.shape_cast %63 : vector<1x8x128xf32> to vector<8x128xf32>
    %65 = vector.shape_cast %49 : vector<8x128xf32> to vector<1x8x128xf32>
    tpu.vector_store %arg3[%c1_25, %c0_26, %c0_27], %65 {strides = array<i32>} : memref<8x8x128xf32, #tpu.memory_space<vmem>>, vector<1x8x128xf32>,
    %c1_28 = arith.constant 1 : index
    %c0_29 = arith.constant 0 : index
    %c0_30 = arith.constant 0 : index
    %66 = vector.load %arg4[%c1_28, %c0_29, %c0_30] : memref<8x8x128xf32, #tpu.memory_space<vmem>>, vector<1x8x128xf32>
    %67 = vector.shape_cast %66 : vector<1x8x128xf32> to vector<8x128xf32>
    %68 = vector.shape_cast %55 : vector<8x128xf32> to vector<1x8x128xf32>
    tpu.vector_store %arg4[%c1_28, %c0_29, %c0_30], %68 {strides = array<i32>} : memref<8x8x128xf32, #tpu.memory_space<vmem>>, vector<1x8x128xf32>,
    %c1_31 = arith.constant 1 : index
    %c0_32 = arith.constant 0 : index
    %c0_33 = arith.constant 0 : index
    %69 = vector.load %arg5[%c1_31, %c0_32, %c0_33] : memref<8x8x128xf32, #tpu.memory_space<vmem>>, vector<1x8x128xf32>
    %70 = vector.shape_cast %69 : vector<1x8x128xf32> to vector<8x128xf32>
    %71 = vector.shape_cast %57 : vector<8x128xf32> to vector<1x8x128xf32>
    tpu.vector_store %arg5[%c1_31, %c0_32, %c0_33], %71 {strides = array<i32>} : memref<8x8x128xf32, #tpu.memory_space<vmem>>, vector<1x8x128xf32>,
    %72 = arith.truncf %62 : vector<8x128xf32> to vector<8x128xbf16>
    %cst_34 = arith.constant dense<0.000000e+00> : vector<8x384xf32>
    %73 = tpu.matmul %72, %3, %cst_34 {dimension_numbers = #tpu.dot_dimension_numbers<[1], [0], [0], [1], [0, 0, 1, 1], [], []>} : vector<8x128xbf16>, vector<128x384xbf16>, vector<8x384xf32> -> vector<8x384xf32>
    %c2 = arith.constant 2 : index
    %c0_35 = arith.constant 0 : index
    %c0_36 = arith.constant 0 : index
    %74 = vector.load %arg1[%c2, %c0_35, %c0_36] : memref<8x8x384xf32, #tpu.memory_space<vmem>>, vector<1x8x384xf32>
    %75 = vector.shape_cast %74 : vector<1x8x384xf32> to vector<8x384xf32>
    %76 = arith.addf %73, %75 : vector<8x384xf32>
    %77 = vector.extract_strided_slice %76 {offsets = [0, 0], sizes = [8, 128], strides = [1, 1]} : vector<8x384xf32> to vector<8x128xf32>
    %78 = arith.negf %77 : vector<8x128xf32>
    %79 = math.exp %78 : vector<8x128xf32>
    %cst_37 = arith.constant 1.000000e+00 : f32
    %80 = vector.broadcast %cst_37 : f32 to vector<8x128xf32>
    %81 = arith.addf %80, %79 : vector<8x128xf32>
    %82 = arith.divf %80, %81 : vector<8x128xf32>
    %83 = vector.extract_strided_slice %76 {offsets = [0, 128], sizes = [8, 128], strides = [1, 1]} : vector<8x384xf32> to vector<8x128xf32>
    %84 = arith.negf %83 : vector<8x128xf32>
    %85 = math.exp %84 : vector<8x128xf32>
    %cst_38 = arith.constant 1.000000e+00 : f32
    %86 = vector.broadcast %cst_38 : f32 to vector<8x128xf32>
    %87 = arith.addf %86, %85 : vector<8x128xf32>
    %88 = arith.divf %86, %87 : vector<8x128xf32>
    %89 = vector.extract_strided_slice %76 {offsets = [0, 256], sizes = [8, 128], strides = [1, 1]} : vector<8x384xf32> to vector<8x128xf32>
    %90 = math.tanh %89 : vector<8x128xf32>
    %91 = arith.subf %60, %90 : vector<8x128xf32>
    %92 = arith.mulf %82, %91 : vector<8x128xf32>
    %93 = arith.addf %90, %92 : vector<8x128xf32>
    %94 = math.tanh %93 : vector<8x128xf32>
    %95 = arith.mulf %88, %94 : vector<8x128xf32>
    %c2_39 = arith.constant 2 : index
    %c0_40 = arith.constant 0 : index
    %c0_41 = arith.constant 0 : index
    %96 = vector.load %arg3[%c2_39, %c0_40, %c0_41] : memref<8x8x128xf32, #tpu.memory_space<vmem>>, vector<1x8x128xf32>
    %97 = vector.shape_cast %96 : vector<1x8x128xf32> to vector<8x128xf32>
    %98 = vector.shape_cast %82 : vector<8x128xf32> to vector<1x8x128xf32>
    tpu.vector_store %arg3[%c2_39, %c0_40, %c0_41], %98 {strides = array<i32>} : memref<8x8x128xf32, #tpu.memory_space<vmem>>, vector<1x8x128xf32>,
    %c2_42 = arith.constant 2 : index
    %c0_43 = arith.constant 0 : index
    %c0_44 = arith.constant 0 : index
    %99 = vector.load %arg4[%c2_42, %c0_43, %c0_44] : memref<8x8x128xf32, #tpu.memory_space<vmem>>, vector<1x8x128xf32>
    %100 = vector.shape_cast %99 : vector<1x8x128xf32> to vector<8x128xf32>
    %101 = vector.shape_cast %88 : vector<8x128xf32> to vector<1x8x128xf32>
    tpu.vector_store %arg4[%c2_42, %c0_43, %c0_44], %101 {strides = array<i32>} : memref<8x8x128xf32, #tpu.memory_space<vmem>>, vector<1x8x128xf32>,
    %c2_45 = arith.constant 2 : index
    %c0_46 = arith.constant 0 : index
    %c0_47 = arith.constant 0 : index
    %102 = vector.load %arg5[%c2_45, %c0_46, %c0_47] : memref<8x8x128xf32, #tpu.memory_space<vmem>>, vector<1x8x128xf32>
    %103 = vector.shape_cast %102 : vector<1x8x128xf32> to vector<8x128xf32>
    %104 = vector.shape_cast %90 : vector<8x128xf32> to vector<1x8x128xf32>
    tpu.vector_store %arg5[%c2_45, %c0_46, %c0_47], %104 {strides = array<i32>} : memref<8x8x128xf32, #tpu.memory_space<vmem>>, vector<1x8x128xf32>,
    %105 = arith.truncf %95 : vector<8x128xf32> to vector<8x128xbf16>
    %cst_48 = arith.constant dense<0.000000e+00> : vector<8x384xf32>
    %106 = tpu.matmul %105, %3, %cst_48 {dimension_numbers = #tpu.dot_dimension_numbers<[1], [0], [0], [1], [0, 0, 1, 1], [], []>} : vector<8x128xbf16>, vector<128x384xbf16>, vector<8x384xf32> -> vector<8x384xf32>
    %c3 = arith.constant 3 : index
    %c0_49 = arith.constant 0 : index
    %c0_50 = arith.constant 0 : index
    %107 = vector.load %arg1[%c3, %c0_49, %c0_50] : memref<8x8x384xf32, #tpu.memory_space<vmem>>, vector<1x8x384xf32>
    %108 = vector.shape_cast %107 : vector<1x8x384xf32> to vector<8x384xf32>
    %109 = arith.addf %106, %108 : vector<8x384xf32>
    %110 = vector.extract_strided_slice %109 {offsets = [0, 0], sizes = [8, 128], strides = [1, 1]} : vector<8x384xf32> to vector<8x128xf32>
    %111 = arith.negf %110 : vector<8x128xf32>
    %112 = math.exp %111 : vector<8x128xf32>
    %cst_51 = arith.constant 1.000000e+00 : f32
    %113 = vector.broadcast %cst_51 : f32 to vector<8x128xf32>
    %114 = arith.addf %113, %112 : vector<8x128xf32>
    %115 = arith.divf %113, %114 : vector<8x128xf32>
    %116 = vector.extract_strided_slice %109 {offsets = [0, 128], sizes = [8, 128], strides = [1, 1]} : vector<8x384xf32> to vector<8x128xf32>
    %117 = arith.negf %116 : vector<8x128xf32>
    %118 = math.exp %117 : vector<8x128xf32>
    %cst_52 = arith.constant 1.000000e+00 : f32
    %119 = vector.broadcast %cst_52 : f32 to vector<8x128xf32>
    %120 = arith.addf %119, %118 : vector<8x128xf32>
    %121 = arith.divf %119, %120 : vector<8x128xf32>
    %122 = vector.extract_strided_slice %109 {offsets = [0, 256], sizes = [8, 128], strides = [1, 1]} : vector<8x384xf32> to vector<8x128xf32>
    %123 = math.tanh %122 : vector<8x128xf32>
    %124 = arith.subf %93, %123 : vector<8x128xf32>
    %125 = arith.mulf %115, %124 : vector<8x128xf32>
    %126 = arith.addf %123, %125 : vector<8x128xf32>
    %127 = math.tanh %126 : vector<8x128xf32>
    %128 = arith.mulf %121, %127 : vector<8x128xf32>
    %c3_53 = arith.constant 3 : index
    %c0_54 = arith.constant 0 : index
    %c0_55 = arith.constant 0 : index
    %129 = vector.load %arg3[%c3_53, %c0_54, %c0_55] : memref<8x8x128xf32, #tpu.memory_space<vmem>>, vector<1x8x128xf32>
    %130 = vector.shape_cast %129 : vector<1x8x128xf32> to vector<8x128xf32>
    %131 = vector.shape_cast %115 : vector<8x128xf32> to vector<1x8x128xf32>
    tpu.vector_store %arg3[%c3_53, %c0_54, %c0_55], %131 {strides = array<i32>} : memref<8x8x128xf32, #tpu.memory_space<vmem>>, vector<1x8x128xf32>,
    %c3_56 = arith.constant 3 : index
    %c0_57 = arith.constant 0 : index
    %c0_58 = arith.constant 0 : index
    %132 = vector.load %arg4[%c3_56, %c0_57, %c0_58] : memref<8x8x128xf32, #tpu.memory_space<vmem>>, vector<1x8x128xf32>
    %133 = vector.shape_cast %132 : vector<1x8x128xf32> to vector<8x128xf32>
    %134 = vector.shape_cast %121 : vector<8x128xf32> to vector<1x8x128xf32>
    tpu.vector_store %arg4[%c3_56, %c0_57, %c0_58], %134 {strides = array<i32>} : memref<8x8x128xf32, #tpu.memory_space<vmem>>, vector<1x8x128xf32>,
    %c3_59 = arith.constant 3 : index
    %c0_60 = arith.constant 0 : index
    %c0_61 = arith.constant 0 : index
    %135 = vector.load %arg5[%c3_59, %c0_60, %c0_61] : memref<8x8x128xf32, #tpu.memory_space<vmem>>, vector<1x8x128xf32>
    %136 = vector.shape_cast %135 : vector<1x8x128xf32> to vector<8x128xf32>
    %137 = vector.shape_cast %123 : vector<8x128xf32> to vector<1x8x128xf32>
    tpu.vector_store %arg5[%c3_59, %c0_60, %c0_61], %137 {strides = array<i32>} : memref<8x8x128xf32, #tpu.memory_space<vmem>>, vector<1x8x128xf32>,
    %138 = arith.truncf %128 : vector<8x128xf32> to vector<8x128xbf16>
    %cst_62 = arith.constant dense<0.000000e+00> : vector<8x384xf32>
    %139 = tpu.matmul %138, %3, %cst_62 {dimension_numbers = #tpu.dot_dimension_numbers<[1], [0], [0], [1], [0, 0, 1, 1], [], []>} : vector<8x128xbf16>, vector<128x384xbf16>, vector<8x384xf32> -> vector<8x384xf32>
    %c4 = arith.constant 4 : index
    %c0_63 = arith.constant 0 : index
    %c0_64 = arith.constant 0 : index
    %140 = vector.load %arg1[%c4, %c0_63, %c0_64] : memref<8x8x384xf32, #tpu.memory_space<vmem>>, vector<1x8x384xf32>
    %141 = vector.shape_cast %140 : vector<1x8x384xf32> to vector<8x384xf32>
    %142 = arith.addf %139, %141 : vector<8x384xf32>
    %143 = vector.extract_strided_slice %142 {offsets = [0, 0], sizes = [8, 128], strides = [1, 1]} : vector<8x384xf32> to vector<8x128xf32>
    %144 = arith.negf %143 : vector<8x128xf32>
    %145 = math.exp %144 : vector<8x128xf32>
    %cst_65 = arith.constant 1.000000e+00 : f32
    %146 = vector.broadcast %cst_65 : f32 to vector<8x128xf32>
    %147 = arith.addf %146, %145 : vector<8x128xf32>
    %148 = arith.divf %146, %147 : vector<8x128xf32>
    %149 = vector.extract_strided_slice %142 {offsets = [0, 128], sizes = [8, 128], strides = [1, 1]} : vector<8x384xf32> to vector<8x128xf32>
    %150 = arith.negf %149 : vector<8x128xf32>
    %151 = math.exp %150 : vector<8x128xf32>
    %cst_66 = arith.constant 1.000000e+00 : f32
    %152 = vector.broadcast %cst_66 : f32 to vector<8x128xf32>
    %153 = arith.addf %152, %151 : vector<8x128xf32>
    %154 = arith.divf %152, %153 : vector<8x128xf32>
    %155 = vector.extract_strided_slice %142 {offsets = [0, 256], sizes = [8, 128], strides = [1, 1]} : vector<8x384xf32> to vector<8x128xf32>
    %156 = math.tanh %155 : vector<8x128xf32>
    %157 = arith.subf %126, %156 : vector<8x128xf32>
    %158 = arith.mulf %148, %157 : vector<8x128xf32>
    %159 = arith.addf %156, %158 : vector<8x128xf32>
    %160 = math.tanh %159 : vector<8x128xf32>
    %161 = arith.mulf %154, %160 : vector<8x128xf32>
    %c4_67 = arith.constant 4 : index
    %c0_68 = arith.constant 0 : index
    %c0_69 = arith.constant 0 : index
    %162 = vector.load %arg3[%c4_67, %c0_68, %c0_69] : memref<8x8x128xf32, #tpu.memory_space<vmem>>, vector<1x8x128xf32>
    %163 = vector.shape_cast %162 : vector<1x8x128xf32> to vector<8x128xf32>
    %164 = vector.shape_cast %148 : vector<8x128xf32> to vector<1x8x128xf32>
    tpu.vector_store %arg3[%c4_67, %c0_68, %c0_69], %164 {strides = array<i32>} : memref<8x8x128xf32, #tpu.memory_space<vmem>>, vector<1x8x128xf32>,
    %c4_70 = arith.constant 4 : index
    %c0_71 = arith.constant 0 : index
    %c0_72 = arith.constant 0 : index
    %165 = vector.load %arg4[%c4_70, %c0_71, %c0_72] : memref<8x8x128xf32, #tpu.memory_space<vmem>>, vector<1x8x128xf32>
    %166 = vector.shape_cast %165 : vector<1x8x128xf32> to vector<8x128xf32>
    %167 = vector.shape_cast %154 : vector<8x128xf32> to vector<1x8x128xf32>
    tpu.vector_store %arg4[%c4_70, %c0_71, %c0_72], %167 {strides = array<i32>} : memref<8x8x128xf32, #tpu.memory_space<vmem>>, vector<1x8x128xf32>,
    %c4_73 = arith.constant 4 : index
    %c0_74 = arith.constant 0 : index
    %c0_75 = arith.constant 0 : index
    %168 = vector.load %arg5[%c4_73, %c0_74, %c0_75] : memref<8x8x128xf32, #tpu.memory_space<vmem>>, vector<1x8x128xf32>
    %169 = vector.shape_cast %168 : vector<1x8x128xf32> to vector<8x128xf32>
    %170 = vector.shape_cast %156 : vector<8x128xf32> to vector<1x8x128xf32>
    tpu.vector_store %arg5[%c4_73, %c0_74, %c0_75], %170 {strides = array<i32>} : memref<8x8x128xf32, #tpu.memory_space<vmem>>, vector<1x8x128xf32>,
    %171 = arith.truncf %161 : vector<8x128xf32> to vector<8x128xbf16>
    %cst_76 = arith.constant dense<0.000000e+00> : vector<8x384xf32>
    %172 = tpu.matmul %171, %3, %cst_76 {dimension_numbers = #tpu.dot_dimension_numbers<[1], [0], [0], [1], [0, 0, 1, 1], [], []>} : vector<8x128xbf16>, vector<128x384xbf16>, vector<8x384xf32> -> vector<8x384xf32>
    %c5 = arith.constant 5 : index
    %c0_77 = arith.constant 0 : index
    %c0_78 = arith.constant 0 : index
    %173 = vector.load %arg1[%c5, %c0_77, %c0_78] : memref<8x8x384xf32, #tpu.memory_space<vmem>>, vector<1x8x384xf32>
    %174 = vector.shape_cast %173 : vector<1x8x384xf32> to vector<8x384xf32>
    %175 = arith.addf %172, %174 : vector<8x384xf32>
    %176 = vector.extract_strided_slice %175 {offsets = [0, 0], sizes = [8, 128], strides = [1, 1]} : vector<8x384xf32> to vector<8x128xf32>
    %177 = arith.negf %176 : vector<8x128xf32>
    %178 = math.exp %177 : vector<8x128xf32>
    %cst_79 = arith.constant 1.000000e+00 : f32
    %179 = vector.broadcast %cst_79 : f32 to vector<8x128xf32>
    %180 = arith.addf %179, %178 : vector<8x128xf32>
    %181 = arith.divf %179, %180 : vector<8x128xf32>
    %182 = vector.extract_strided_slice %175 {offsets = [0, 128], sizes = [8, 128], strides = [1, 1]} : vector<8x384xf32> to vector<8x128xf32>
    %183 = arith.negf %182 : vector<8x128xf32>
    %184 = math.exp %183 : vector<8x128xf32>
    %cst_80 = arith.constant 1.000000e+00 : f32
    %185 = vector.broadcast %cst_80 : f32 to vector<8x128xf32>
    %186 = arith.addf %185, %184 : vector<8x128xf32>
    %187 = arith.divf %185, %186 : vector<8x128xf32>
    %188 = vector.extract_strided_slice %175 {offsets = [0, 256], sizes = [8, 128], strides = [1, 1]} : vector<8x384xf32> to vector<8x128xf32>
    %189 = math.tanh %188 : vector<8x128xf32>
    %190 = arith.subf %159, %189 : vector<8x128xf32>
    %191 = arith.mulf %181, %190 : vector<8x128xf32>
    %192 = arith.addf %189, %191 : vector<8x128xf32>
    %193 = math.tanh %192 : vector<8x128xf32>
    %194 = arith.mulf %187, %193 : vector<8x128xf32>
    %c5_81 = arith.constant 5 : index
    %c0_82 = arith.constant 0 : index
    %c0_83 = arith.constant 0 : index
    %195 = vector.load %arg3[%c5_81, %c0_82, %c0_83] : memref<8x8x128xf32, #tpu.memory_space<vmem>>, vector<1x8x128xf32>
    %196 = vector.shape_cast %195 : vector<1x8x128xf32> to vector<8x128xf32>
    %197 = vector.shape_cast %181 : vector<8x128xf32> to vector<1x8x128xf32>
    tpu.vector_store %arg3[%c5_81, %c0_82, %c0_83], %197 {strides = array<i32>} : memref<8x8x128xf32, #tpu.memory_space<vmem>>, vector<1x8x128xf32>,
    %c5_84 = arith.constant 5 : index
    %c0_85 = arith.constant 0 : index
    %c0_86 = arith.constant 0 : index
    %198 = vector.load %arg4[%c5_84, %c0_85, %c0_86] : memref<8x8x128xf32, #tpu.memory_space<vmem>>, vector<1x8x128xf32>
    %199 = vector.shape_cast %198 : vector<1x8x128xf32> to vector<8x128xf32>
    %200 = vector.shape_cast %187 : vector<8x128xf32> to vector<1x8x128xf32>
    tpu.vector_store %arg4[%c5_84, %c0_85, %c0_86], %200 {strides = array<i32>} : memref<8x8x128xf32, #tpu.memory_space<vmem>>, vector<1x8x128xf32>,
    %c5_87 = arith.constant 5 : index
    %c0_88 = arith.constant 0 : index
    %c0_89 = arith.constant 0 : index
    %201 = vector.load %arg5[%c5_87, %c0_88, %c0_89] : memref<8x8x128xf32, #tpu.memory_space<vmem>>, vector<1x8x128xf32>
    %202 = vector.shape_cast %201 : vector<1x8x128xf32> to vector<8x128xf32>
    %203 = vector.shape_cast %189 : vector<8x128xf32> to vector<1x8x128xf32>
    tpu.vector_store %arg5[%c5_87, %c0_88, %c0_89], %203 {strides = array<i32>} : memref<8x8x128xf32, #tpu.memory_space<vmem>>, vector<1x8x128xf32>,
    %204 = arith.truncf %194 : vector<8x128xf32> to vector<8x128xbf16>
    %cst_90 = arith.constant dense<0.000000e+00> : vector<8x384xf32>
    %205 = tpu.matmul %204, %3, %cst_90 {dimension_numbers = #tpu.dot_dimension_numbers<[1], [0], [0], [1], [0, 0, 1, 1], [], []>} : vector<8x128xbf16>, vector<128x384xbf16>, vector<8x384xf32> -> vector<8x384xf32>
    %c6 = arith.constant 6 : index
    %c0_91 = arith.constant 0 : index
    %c0_92 = arith.constant 0 : index
    %206 = vector.load %arg1[%c6, %c0_91, %c0_92] : memref<8x8x384xf32, #tpu.memory_space<vmem>>, vector<1x8x384xf32>
    %207 = vector.shape_cast %206 : vector<1x8x384xf32> to vector<8x384xf32>
    %208 = arith.addf %205, %207 : vector<8x384xf32>
    %209 = vector.extract_strided_slice %208 {offsets = [0, 0], sizes = [8, 128], strides = [1, 1]} : vector<8x384xf32> to vector<8x128xf32>
    %210 = arith.negf %209 : vector<8x128xf32>
    %211 = math.exp %210 : vector<8x128xf32>
    %cst_93 = arith.constant 1.000000e+00 : f32
    %212 = vector.broadcast %cst_93 : f32 to vector<8x128xf32>
    %213 = arith.addf %212, %211 : vector<8x128xf32>
    %214 = arith.divf %212, %213 : vector<8x128xf32>
    %215 = vector.extract_strided_slice %208 {offsets = [0, 128], sizes = [8, 128], strides = [1, 1]} : vector<8x384xf32> to vector<8x128xf32>
    %216 = arith.negf %215 : vector<8x128xf32>
    %217 = math.exp %216 : vector<8x128xf32>
    %cst_94 = arith.constant 1.000000e+00 : f32
    %218 = vector.broadcast %cst_94 : f32 to vector<8x128xf32>
    %219 = arith.addf %218, %217 : vector<8x128xf32>
    %220 = arith.divf %218, %219 : vector<8x128xf32>
    %221 = vector.extract_strided_slice %208 {offsets = [0, 256], sizes = [8, 128], strides = [1, 1]} : vector<8x384xf32> to vector<8x128xf32>
    %222 = math.tanh %221 : vector<8x128xf32>
    %223 = arith.subf %192, %222 : vector<8x128xf32>
    %224 = arith.mulf %214, %223 : vector<8x128xf32>
    %225 = arith.addf %222, %224 : vector<8x128xf32>
    %226 = math.tanh %225 : vector<8x128xf32>
    %227 = arith.mulf %220, %226 : vector<8x128xf32>
    %c6_95 = arith.constant 6 : index
    %c0_96 = arith.constant 0 : index
    %c0_97 = arith.constant 0 : index
    %228 = vector.load %arg3[%c6_95, %c0_96, %c0_97] : memref<8x8x128xf32, #tpu.memory_space<vmem>>, vector<1x8x128xf32>
    %229 = vector.shape_cast %228 : vector<1x8x128xf32> to vector<8x128xf32>
    %230 = vector.shape_cast %214 : vector<8x128xf32> to vector<1x8x128xf32>
    tpu.vector_store %arg3[%c6_95, %c0_96, %c0_97], %230 {strides = array<i32>} : memref<8x8x128xf32, #tpu.memory_space<vmem>>, vector<1x8x128xf32>,
    %c6_98 = arith.constant 6 : index
    %c0_99 = arith.constant 0 : index
    %c0_100 = arith.constant 0 : index
    %231 = vector.load %arg4[%c6_98, %c0_99, %c0_100] : memref<8x8x128xf32, #tpu.memory_space<vmem>>, vector<1x8x128xf32>
    %232 = vector.shape_cast %231 : vector<1x8x128xf32> to vector<8x128xf32>
    %233 = vector.shape_cast %220 : vector<8x128xf32> to vector<1x8x128xf32>
    tpu.vector_store %arg4[%c6_98, %c0_99, %c0_100], %233 {strides = array<i32>} : memref<8x8x128xf32, #tpu.memory_space<vmem>>, vector<1x8x128xf32>,
    %c6_101 = arith.constant 6 : index
    %c0_102 = arith.constant 0 : index
    %c0_103 = arith.constant 0 : index
    %234 = vector.load %arg5[%c6_101, %c0_102, %c0_103] : memref<8x8x128xf32, #tpu.memory_space<vmem>>, vector<1x8x128xf32>
    %235 = vector.shape_cast %234 : vector<1x8x128xf32> to vector<8x128xf32>
    %236 = vector.shape_cast %222 : vector<8x128xf32> to vector<1x8x128xf32>
    tpu.vector_store %arg5[%c6_101, %c0_102, %c0_103], %236 {strides = array<i32>} : memref<8x8x128xf32, #tpu.memory_space<vmem>>, vector<1x8x128xf32>,
    %237 = arith.truncf %227 : vector<8x128xf32> to vector<8x128xbf16>
    %cst_104 = arith.constant dense<0.000000e+00> : vector<8x384xf32>
    %238 = tpu.matmul %237, %3, %cst_104 {dimension_numbers = #tpu.dot_dimension_numbers<[1], [0], [0], [1], [0, 0, 1, 1], [], []>} : vector<8x128xbf16>, vector<128x384xbf16>, vector<8x384xf32> -> vector<8x384xf32>
    %c7 = arith.constant 7 : index
    %c0_105 = arith.constant 0 : index
    %c0_106 = arith.constant 0 : index
    %239 = vector.load %arg1[%c7, %c0_105, %c0_106] : memref<8x8x384xf32, #tpu.memory_space<vmem>>, vector<1x8x384xf32>
    %240 = vector.shape_cast %239 : vector<1x8x384xf32> to vector<8x384xf32>
    %241 = arith.addf %238, %240 : vector<8x384xf32>
    %242 = vector.extract_strided_slice %241 {offsets = [0, 0], sizes = [8, 128], strides = [1, 1]} : vector<8x384xf32> to vector<8x128xf32>
    %243 = arith.negf %242 : vector<8x128xf32>
    %244 = math.exp %243 : vector<8x128xf32>
    %cst_107 = arith.constant 1.000000e+00 : f32
    %245 = vector.broadcast %cst_107 : f32 to vector<8x128xf32>
    %246 = arith.addf %245, %244 : vector<8x128xf32>
    %247 = arith.divf %245, %246 : vector<8x128xf32>
    %248 = vector.extract_strided_slice %241 {offsets = [0, 128], sizes = [8, 128], strides = [1, 1]} : vector<8x384xf32> to vector<8x128xf32>
    %249 = arith.negf %248 : vector<8x128xf32>
    %250 = math.exp %249 : vector<8x128xf32>
    %cst_108 = arith.constant 1.000000e+00 : f32
    %251 = vector.broadcast %cst_108 : f32 to vector<8x128xf32>
    %252 = arith.addf %251, %250 : vector<8x128xf32>
    %253 = arith.divf %251, %252 : vector<8x128xf32>
    %254 = vector.extract_strided_slice %241 {offsets = [0, 256], sizes = [8, 128], strides = [1, 1]} : vector<8x384xf32> to vector<8x128xf32>
    %255 = math.tanh %254 : vector<8x128xf32>
    %256 = arith.subf %225, %255 : vector<8x128xf32>
    %257 = arith.mulf %247, %256 : vector<8x128xf32>
    %258 = arith.addf %255, %257 : vector<8x128xf32>
    %259 = math.tanh %258 : vector<8x128xf32>
    %260 = arith.mulf %253, %259 : vector<8x128xf32>
    %c7_109 = arith.constant 7 : index
    %c0_110 = arith.constant 0 : index
    %c0_111 = arith.constant 0 : index
    %261 = vector.load %arg3[%c7_109, %c0_110, %c0_111] : memref<8x8x128xf32, #tpu.memory_space<vmem>>, vector<1x8x128xf32>
    %262 = vector.shape_cast %261 : vector<1x8x128xf32> to vector<8x128xf32>
    %263 = vector.shape_cast %247 : vector<8x128xf32> to vector<1x8x128xf32>
    tpu.vector_store %arg3[%c7_109, %c0_110, %c0_111], %263 {strides = array<i32>} : memref<8x8x128xf32, #tpu.memory_space<vmem>>, vector<1x8x128xf32>,
    %c7_112 = arith.constant 7 : index
    %c0_113 = arith.constant 0 : index
    %c0_114 = arith.constant 0 : index
    %264 = vector.load %arg4[%c7_112, %c0_113, %c0_114] : memref<8x8x128xf32, #tpu.memory_space<vmem>>, vector<1x8x128xf32>
    %265 = vector.shape_cast %264 : vector<1x8x128xf32> to vector<8x128xf32>
    %266 = vector.shape_cast %253 : vector<8x128xf32> to vector<1x8x128xf32>
    tpu.vector_store %arg4[%c7_112, %c0_113, %c0_114], %266 {strides = array<i32>} : memref<8x8x128xf32, #tpu.memory_space<vmem>>, vector<1x8x128xf32>,
    %c7_115 = arith.constant 7 : index
    %c0_116 = arith.constant 0 : index
    %c0_117 = arith.constant 0 : index
    %267 = vector.load %arg5[%c7_115, %c0_116, %c0_117] : memref<8x8x128xf32, #tpu.memory_space<vmem>>, vector<1x8x128xf32>
    %268 = vector.shape_cast %267 : vector<1x8x128xf32> to vector<8x128xf32>
    %269 = vector.shape_cast %255 : vector<8x128xf32> to vector<1x8x128xf32>
    tpu.vector_store %arg5[%c7_115, %c0_116, %c0_117], %269 {strides = array<i32>} : memref<8x8x128xf32, #tpu.memory_space<vmem>>, vector<1x8x128xf32>,
    %c0_118 = arith.constant 0 : index
    %c0_119 = arith.constant 0 : index
    %270 = vector.load %arg7[%c0_118, %c0_119] : memref<8x128xf32, #tpu.memory_space<vmem>>, vector<8x128xf32>
    tpu.vector_store %arg7[%c0_118, %c0_119], %260 {strides = array<i32>} : memref<8x128xf32, #tpu.memory_space<vmem>>, vector<8x128xf32>,
    %c0_120 = arith.constant 0 : index
    %c0_121 = arith.constant 0 : index
    %271 = vector.load %arg8[%c0_120, %c0_121] : memref<8x128xf32, #tpu.memory_space<vmem>>, vector<8x128xf32>
    tpu.vector_store %arg8[%c0_120, %c0_121], %258 {strides = array<i32>} : memref<8x128xf32, #tpu.memory_space<vmem>>, vector<8x128xf32>,
    %c0_122 = arith.constant 0 : index
    %c0_123 = arith.constant 0 : index
    %272 = vector.load %arg6[%c0_122, %c0_123] : memref<8x128xf32, #tpu.memory_space<vmem>>, vector<8x128xf32>
    tpu.vector_store %arg6[%c0_122, %c0_123], %260 {strides = array<i32>} : memref<8x128xf32, #tpu.memory_space<vmem>>, vector<8x128xf32>,
    return
  }
  func.func @transform_0(%arg0: i32) -> (i32, i32, i32) {
    %c0_i32 = arith.constant 0 : i32
    %c0_i32_0 = arith.constant 0 : i32
    %c0_i32_1 = arith.constant 0 : i32
    return %arg0, %c0_i32, %c0_i32_0 : i32, i32, i32
  }
  func.func @transform_1(%arg0: i32) -> (i32, i32) {
    %c0_i32 = arith.constant 0 : i32
    %c0_i32_0 = arith.constant 0 : i32
    %c0_i32_1 = arith.constant 0 : i32
    return %c0_i32, %c0_i32_0 : i32, i32
  }
  func.func @transform_2(%arg0: i32) -> (i32, i32, i32) {
    %c0_i32 = arith.constant 0 : i32
    %c0_i32_0 = arith.constant 0 : i32
    %c0_i32_1 = arith.constant 0 : i32
    return %arg0, %c0_i32, %c0_i32_0 : i32, i32, i32
  }
  func.func @transform_3(%arg0: i32) -> (i32, i32, i32) {
    %c0_i32 = arith.constant 0 : i32
    %c0_i32_0 = arith.constant 0 : i32
    %c0_i32_1 = arith.constant 0 : i32
    return %arg0, %c0_i32, %c0_i32_0 : i32, i32, i32
  }
  func.func @transform_4(%arg0: i32) -> (i32, i32, i32) {
    %c0_i32 = arith.constant 0 : i32
    %c0_i32_0 = arith.constant 0 : i32
    %c0_i32_1 = arith.constant 0 : i32
    return %arg0, %c0_i32, %c0_i32_0 : i32, i32, i32
  }
  func.func @transform_5(%arg0: i32) -> (i32, i32) {
    %c0_i32 = arith.constant 0 : i32
    %c0_i32_0 = arith.constant 0 : i32
    %c0_i32_1 = arith.constant 0 : i32
    return %c0_i32, %c0_i32_0 : i32, i32
  }
}

</mosaic_0001>

<bundles_post_ra>
// kernel: visualize_internal_gates.1
= control target key start
LH: loop header
LB: loop body
LE: loop exit
PB: predicated region body
PF: predicated region fallthrough
CT: control target
= control target key end

     0   :  { %s2502_s0 = inlined_call_operand.vmem [shape: f32[32,8,384], index: 0, kind: input, shape index: {}]   ;;  %s2503_s1 = inlined_call_operand.vmem [shape: bf16[128,384], index: 1, kind: input, shape index: {}]   ;;  %s2504_s2 = inlined_call_operand.hbm [shape: f32[32,8,128], index: 2, kind: output, shape index: {0}]   ;;  %s2505_s3 = inlined_call_operand.hbm [shape: f32[32,8,128], index: 3, kind: output, shape index: {1}]   ;;  %s2506_s4 = inlined_call_operand.hbm [shape: f32[32,8,128], index: 4, kind: output, shape index: {2}]   ;;  %s2507_s5 = inlined_call_operand.vmem [shape: f32[8,128], index: 5, kind: output, shape index: {3}]  }
   0x1   :  { %2510 = sst [smem:[#allocation11_spill]] %s2502_s0 }
   0x2   :  { %11 = vsyncpa [#allocation5], 0 }
   0x3   :  { %13 = vsyncpa [#allocation5 + $0x1], 0 }
   0x4   :  { %14 = vsyncpa [#allocation7], 0 }
   0x5   :  { %16 = vsyncpa [#allocation7 + $0x1], 0  ;;  %s1864_s18 = smov 0   ;;  %s1866_s19 = smov 0  }
   0x6   :  { %s1868_s20 = smov 0   ;;  %s1870_s21 = smov 0  }
   0x7 LB: > { %s1885_s22 = sadd.s32 4294967295, %s1829_s21   ;;  %s2508_s23 = sadd.s32 4294967294, %s1829_s21   ;;  %s1829_s21 = sphi %s1870_s21, %s2520_s21   ;;  %s1825_s20 = sphi %s1868_s20, %s2519_s20   ;;  %s1821_s19 = sphi %s1866_s19, %s2518_s19   ;;  %s1817_s18 = sphi %s1864_s18, %s2517_s18  }
   0x8   : > { %s1889_s24 = sadd.s32 1, %s1829_s21   ;;  %s76_s25 = sadd.s32 1, %s1825_s20 }
   0x9   : > { %s73_s26 = ssub.s32 %s1829_s21, %s1889_s24  ;;  %p86_p0 = scmp.ne.s32.totalorder %s1825_s20, %s1821_s19 }
   0xa   : > { %p74_p1 = scmp.eq.s32.totalorder %s73_s26, 0  ;;  %p87_p2 = scmp.eq.s32.totalorder %s1885_s22, 3 }
   0xb   : > { %p92_p3 = scmp.ne.s32.totalorder %s1821_s19, %s1817_s18  ;;  %p93_p4 = scmp.eq.s32.totalorder %s2508_s23, 3 }
   0xc   : > { %s1902_s27 = scalar_select %p74_p1, %s1825_s20, %s76_s25  }
   0xd   : > { %p1904_p5 = por %p87_p2, %p86_p0  ;;  %p1908_p6 = por %p93_p4, %p92_p3 }
   0xe   : > { %p1359_p7 = scmp.ge.s32.totalorder %s1829_s21, 1  ;;  %p197_p8 = scmp.lt.s32.totalorder %s1829_s21, 5 }
  0x10   : > { %p198_p9 = pnand %p1359_p7, %p197_p8 }
  0x11   : > { %s2509_s30 = sand.u32 (!%p198_p9), 1, %s1821_s19   ;;  %s1363_s6 = sshll.u32 (!%p198_p9), %s1885_s22, 3 }
  0x12   : > { %201 = sbr.rel (%p198_p9) target bundleno = 1481 (0x5c9), region = 28  ;;  %s1360_s7 = sshll.u32 (!%p198_p9), %s2509_s30, 6 }
  0x13   : > { %p237_p10 = scmp.lt.s32.totalorder (!%p198_p9), %s1363_s6, 31  ;;  %s2513_s0 = sld [smem:[#allocation11_spill]] (!%p198_p9) }
  0x14   : > { %s1923_s12 = scalar_lea.vmem (!%p198_p9), [#allocation4], %s1360_s7  ;;  %s1925_s13 = scalar_lea.vmem (!%p198_p9), [#allocation6], %s1360_s7 }
  0x15   : > { %s1927_s14 = scalar_lea.vmem (!%p198_p9), [#allocation8], %s1360_s7  ;;  %p1365_p11 = scmp.ne.s32.totalorder (!%p198_p9), %s1885_s22, 0 }
  0x17   : > { %s2522_s6 = smov (!%p237_p10, %s1363_s6), 31  ;;  %249 = sbr.rel (%p1365_p11) target bundleno = 31 (0x1f), region = 32 }
  0x18   : > { %s1558_s8 = smul.u32 24, %s2522_s6 }
  0x1a   : > { %s1921_s11 = scalar_lea.vmem %s2513_s0, %s1558_s8 }
  0x1c   : > { %v1831_v0 = vmov 0.0  }
  0x1d   : > { %250 = vst [vmem:[#allocation2] sm:$0xff] %v1831_v0 }
  0x1e   : > { %251 = vst [vmem:[#allocation3] sm:$0xff] %v1831_v0 }
  0x1f PF: > { %v1452_v1 = vld [vmem:[%s2503_s1 + $0xa8] sm:$0xf]  ;;  %v1553_v2 = vld [vmem:[%s2503_s1 + $0xb0] sm:$0xf0]  ;;  %v1552_v3 = vld [vmem:[%s2503_s1 + $0xac] sm:$0xf] }
  0x20   : > { %v1939_v4 = vor.u32 %v1553_v2, %v1452_v1  ;;  %v1454_v5 = vld [vmem:[%s2503_s1 + $0xb4] sm:$0xf0]  ;;  %v1440_v6 = vld [vmem:[%s2503_s1 + $0x90] sm:$0xf]  ;;  %v1550_v7 = vld [vmem:[%s2503_s1 + $0x98] sm:$0xf0] }
  0x21   : > { %v1950_v8 = vor.u32 %v1552_v3, %v1454_v5  ;;  %v1549_v9 = vld [vmem:[%s2503_s1 + $0x94] sm:$0xf]  ;;  %v1442_v10 = vld [vmem:[%s2503_s1 + $0x9c] sm:$0xf0]  ;;  %v1460_v11 = vld [vmem:[%s2503_s1 + $0xb0] sm:$0xf]  ;;  %v1962_v12 = vor.u32 %v1550_v7, %v1440_v6 }
  0x22   : > { %418 = vmatpush.bf16.msra.mxu0 %v1939_v4  ;;  %v1554_v13 = vld [vmem:[%s2503_s1 + $0xb8] sm:$0xf0]  ;;  %509 = vmatpush.bf16.msra.mxu3 %v1939_v4  ;;  %v1969_v14 = vor.u32 %v1549_v9, %v1442_v10  ;;  %v1428_v16 = vld [vmem:[%s2503_s1 + $0x78] sm:$0xf]  ;;  %v1547_v17 = vld [vmem:[%s2503_s1 + $0x80] sm:$0xf0] }
  0x23   : > { %431 = vmatpush.bf16.msra.mxu1 %v1950_v8  ;;  %v1971_v15 = vor.u32 %v1554_v13, %v1460_v11  ;;  %v1448_v18 = vld [vmem:[%s2503_s1 + $0x98] sm:$0xf]  ;;  %v1546_v19 = vld [vmem:[%s2503_s1 + $0x7c] sm:$0xf]  ;;  %v1430_v20 = vld [vmem:[%s2503_s1 + $0x84] sm:$0xf0]  ;;  %v1995_v23 = vor.u32 %v1547_v17, %v1428_v16 }
  0x24   : > { %v1551_v21 = vld [vmem:[%s2503_s1 + $0xa0] sm:$0xf0]  ;;  %v1436_v24 = vld [vmem:[%s2503_s1 + $0x80] sm:$0xf]  ;;  %v1548_v25 = vld [vmem:[%s2503_s1 + $0x88] sm:$0xf0]  ;;  %v2005_v26 = vor.u32 %v1546_v19, %v1430_v20 }
  0x25   : > { %444 = vmatpush.bf16.msra.mxu2 %v1971_v15  ;;  %v1992_v22 = vor.u32 %v1551_v21, %v1448_v18  ;;  %v1416_v27 = vld [vmem:[%s2503_s1 + $0x60] sm:$0xf]  ;;  %v1544_v28 = vld [vmem:[%s2503_s1 + $0x68] sm:$0xf0]  ;;  %v1543_v29 = vld [vmem:[%s2503_s1 + $0x64] sm:$0xf]  ;;  %v2020_v31 = vor.u32 %v1548_v25, %v1436_v24 }
  0x26   : > { %419 = vmatpush.bf16.msra.mxu0 %v1962_v12  ;;  %510 = vmatpush.bf16.msra.mxu3 %v1962_v12  ;;  %v1418_v30 = vld [vmem:[%s2503_s1 + $0x6c] sm:$0xf0]  ;;  %v2023_v32 = vor.u32 %v1544_v28, %v1416_v27  ;;  %v1424_v33 = vld [vmem:[%s2503_s1 + $0x68] sm:$0xf]  ;;  %v1545_v34 = vld [vmem:[%s2503_s1 + $0x70] sm:$0xf0] }
  0x27   : > { %432 = vmatpush.bf16.msra.mxu1 %v1969_v14  ;;  %v2033_v35 = vor.u32 %v1543_v29, %v1418_v30  ;;  %v1404_v36 = vld [vmem:[%s2503_s1 + $0x48] sm:$0xf]  ;;  %v1541_v37 = vld [vmem:[%s2503_s1 + $0x50] sm:$0xf0]  ;;  %v1540_v38 = vld [vmem:[%s2503_s1 + $0x4c] sm:$0xf]  ;;  %v2048_v40 = vor.u32 %v1545_v34, %v1424_v33 }
  0x28   : > { %v1406_v39 = vld [vmem:[%s2503_s1 + $0x54] sm:$0xf0]  ;;  %v2051_v41 = vor.u32 %v1541_v37, %v1404_v36  ;;  %v1412_v42 = vld [vmem:[%s2503_s1 + $0x50] sm:$0xf]  ;;  %v1542_v43 = vld [vmem:[%s2503_s1 + $0x58] sm:$0xf0] }
  0x29   : > { %445 = vmatpush.bf16.msra.mxu2 %v1992_v22  ;;  %v2061_v44 = vor.u32 %v1540_v38, %v1406_v39  ;;  %v1392_v45 = vld [vmem:[%s2503_s1 + $0x30] sm:$0xf]  ;;  %v1538_v46 = vld [vmem:[%s2503_s1 + $0x38] sm:$0xf0]  ;;  %v1537_v47 = vld [vmem:[%s2503_s1 + $0x34] sm:$0xf]  ;;  %v2076_v49 = vor.u32 %v1542_v43, %v1412_v42 }
  0x2a   : > { %420 = vmatpush.bf16.msra.mxu0 %v1995_v23  ;;  %511 = vmatpush.bf16.msra.mxu3 %v1995_v23  ;;  %v1394_v48 = vld [vmem:[%s2503_s1 + $0x3c] sm:$0xf0]  ;;  %v2079_v50 = vor.u32 %v1538_v46, %v1392_v45  ;;  %v1400_v51 = vld [vmem:[%s2503_s1 + $0x38] sm:$0xf]  ;;  %v1539_v52 = vld [vmem:[%s2503_s1 + $0x40] sm:$0xf0] }
  0x2b   : > { %433 = vmatpush.bf16.msra.mxu1 %v2005_v26  ;;  %v2089_v53 = vor.u32 %v1537_v47, %v1394_v48  ;;  %v1380_v54 = vld [vmem:[%s2503_s1 + $0x18] sm:$0xf]  ;;  %v1535_v55 = vld [vmem:[%s2503_s1 + $0x20] sm:$0xf0]  ;;  %v1534_v56 = vld [vmem:[%s2503_s1 + $0x1c] sm:$0xf]  ;;  %v2104_v58 = vor.u32 %v1539_v52, %v1400_v51 }
  0x2c   : > { %v1382_v57 = vld [vmem:[%s2503_s1 + $0x24] sm:$0xf0]  ;;  %v2107_v59 = vor.u32 %v1535_v55, %v1380_v54  ;;  %v1388_v60 = vld [vmem:[%s2503_s1 + $0x20] sm:$0xf]  ;;  %v1536_v61 = vld [vmem:[%s2503_s1 + $0x28] sm:$0xf0] }
  0x2d   : > { %446 = vmatpush.bf16.msra.mxu2 %v2020_v31  ;;  %v2117_v62 = vor.u32 %v1534_v56, %v1382_v57  ;;  %v1368_v63 = vld [vmem:[%s2503_s1] sm:$0xf]  ;;  %v1532_v0 = vld [vmem:[%s2503_s1 + $0x8] sm:$0xf0]  ;;  %v1531_v1 = vld [vmem:[%s2503_s1 + $0x4] sm:$0xf]  ;;  %v2132_v3 = vor.u32 %v1536_v61, %v1388_v60 }
  0x2e   : > { %421 = vmatpush.bf16.msra.mxu0 %v2023_v32  ;;  %512 = vmatpush.bf16.msra.mxu3 %v2023_v32  ;;  %v1370_v2 = vld [vmem:[%s2503_s1 + $0xc] sm:$0xf0]  ;;  %v2135_v5 = vor.u32 %v1532_v0, %v1368_v63  ;;  %v284_v6 = vld [vmem:[#allocation2] sm:$0xff]  ;;  %v1376_v7 = vld [vmem:[%s2503_s1 + $0x8] sm:$0xf]  ;;  %s1188_s6 = sshll.u32 %s1923_s12, 4  ;;  %s2402_s6 = int_to_ptr.vmem [resolvable:$true] %s1188_s6 }
  0x2f   : > { %434 = vmatpush.bf16.msra.mxu1 %v2033_v35  ;;  %v1533_v9 = vld [vmem:[%s2503_s1 + $0x10] sm:$0xf0]  ;;  %v2145_v10 = vor.u32 %v1531_v1, %v1370_v2  ;;  %v286_v11 = vpack.c.bf16 %v284_v6, %v284_v6  ;;  %v287_v16 = vld [vmem:[%s1921_s11] sm:$0xff]  ;;  %v288_v17 = vld [vmem:[%s1921_s11 + $0x8] sm:$0xff]  ;;  %s1205_s23 = sshll.u32 %s1925_s13, 4  ;;  %s1206_s23 = int_to_ptr.vmem [resolvable:$true] %s1205_s23 }
  0x30   : > { %v2148_v13 = vor.u32 %v1533_v9, %v1376_v7  ;;  %v289_v27 = vld [vmem:[%s1921_s11 + $0x10] sm:$0xff]  ;;  %v285_v54 = vld [vmem:[#allocation3] sm:$0xff] }
  0x31   : > { %447 = vmatpush.bf16.msra.mxu2 %v2048_v40 }
  0x32   : > { %422 = vmatpush.bf16.msra.mxu0 %v2051_v41  ;;  %513 = vmatpush.bf16.msra.mxu3 %v2051_v41 }
  0x33   : > { %435 = vmatpush.bf16.msra.mxu1 %v2061_v44 }
  0x35   : > { %448 = vmatpush.bf16.msra.mxu2 %v2076_v49 }
  0x36   : > { %423 = vmatpush.bf16.msra.mxu0 %v2079_v50  ;;  %514 = vmatpush.bf16.msra.mxu3 %v2079_v50 }
  0x37   : > { %436 = vmatpush.bf16.msra.mxu1 %v2089_v53 }
  0x39   : > { %449 = vmatpush.bf16.msra.mxu2 %v2104_v58 }
  0x3a   : > { %424 = vmatpush.bf16.msra.mxu0 %v2107_v59  ;;  %515 = vmatpush.bf16.msra.mxu3 %v2107_v59 }
  0x3b   : > { %437 = vmatpush.bf16.msra.mxu1 %v2117_v62 }
  0x3d   : > { %450 = vmatpush.bf16.msra.mxu2 %v2132_v3 }
  0x3e   : > { %425 = vmatpush.bf16.msra.mxu0 %v2135_v5  ;;  %516 = vmatpush.bf16.msra.mxu3 %v2135_v5 }
  0x3f   : > { %438 = vmatpush.bf16.msra.mxu1 %v2145_v10 }
  0x41   : > { %426 = vmatmul.bf16.vlgmr.msra.gmra.mxu0 %v286_v11  ;;  %451 = vmatpush.bf16.msra.mxu2 %v2148_v13 }
  0x42   : > { %522 = vmatpush.bf16.msrb.mxu0 %v1950_v8  ;;  %616 = vmatpush.bf16.msrb.mxu3 %v1950_v8 }
  0x43   : > { %535 = vmatpush.bf16.msrb.mxu1 %v1971_v15 }
  0x44   : > { %439 = vmatmul.bf16.vlgmr.msra.gmra.mxu1 %v286_v11  ;;  %452 = vmatmul.bf16.vlgmr.msra.gmra.mxu2 %v286_v11 }
  0x45   : > { %603 = vmatpush.bf16.msrb.mxu2 %v1939_v4 }
  0x46   : > { %523 = vmatpush.bf16.msrb.mxu0 %v1969_v14  ;;  %617 = vmatpush.bf16.msrb.mxu3 %v1969_v14 }
  0x47   : > { %536 = vmatpush.bf16.msrb.mxu1 %v1992_v22 }
  0x49   : > { %604 = vmatpush.bf16.msrb.mxu2 %v1962_v12 }
  0x4a   : > { %524 = vmatpush.bf16.msrb.mxu0 %v2005_v26  ;;  %618 = vmatpush.bf16.msrb.mxu3 %v2005_v26 }
  0x4b   : > { %537 = vmatpush.bf16.msrb.mxu1 %v2020_v31 }
  0x4d   : > { %605 = vmatpush.bf16.msrb.mxu2 %v1995_v23 }
  0x4e   : > { %525 = vmatpush.bf16.msrb.mxu0 %v2033_v35  ;;  %619 = vmatpush.bf16.msrb.mxu3 %v2033_v35 }
  0x4f   : > { %538 = vmatpush.bf16.msrb.mxu1 %v2048_v40 }
  0x51   : > { %606 = vmatpush.bf16.msrb.mxu2 %v2023_v32 }
  0x52   : > { %526 = vmatpush.bf16.msrb.mxu0 %v2061_v44  ;;  %620 = vmatpush.bf16.msrb.mxu3 %v2061_v44 }
  0x53   : > { %539 = vmatpush.bf16.msrb.mxu1 %v2076_v49 }
  0x55   : > { %607 = vmatpush.bf16.msrb.mxu2 %v2051_v41 }
  0x56   : > { %527 = vmatpush.bf16.msrb.mxu0 %v2089_v53  ;;  %621 = vmatpush.bf16.msrb.mxu3 %v2089_v53 }
  0x57   : > { %540 = vmatpush.bf16.msrb.mxu1 %v2104_v58 }
  0x59   : > { %608 = vmatpush.bf16.msrb.mxu2 %v2079_v50 }
  0x5a   : > { %528 = vmatpush.bf16.msrb.mxu0 %v2117_v62  ;;  %622 = vmatpush.bf16.msrb.mxu3 %v2117_v62 }
  0x5b   : > { %541 = vmatpush.bf16.msrb.mxu1 %v2132_v3 }
  0x5d   : > { %609 = vmatpush.bf16.msrb.mxu2 %v2107_v59 }
  0x5e   : > { %529 = vmatpush.bf16.msrb.mxu0 %v2145_v10  ;;  %623 = vmatpush.bf16.msrb.mxu3 %v2145_v10 }
  0x5f   : > { %542 = vmatpush.bf16.msrb.mxu1 %v2148_v13 }
  0x61   : > { %610 = vmatpush.bf16.msrb.mxu2 %v2135_v5 }
  0x62   : > { %629 = vmatpush.bf16.msra.mxu0 %v1971_v15 }
  0x63   : > { %697 = vmatpush.bf16.msra.mxu1 %v1939_v4 }
  0x65   : > { %710 = vmatpush.bf16.msra.mxu2 %v1950_v8 }
  0x66   : > { %630 = vmatpush.bf16.msra.mxu0 %v1992_v22 }
  0x67   : > { %698 = vmatpush.bf16.msra.mxu1 %v1962_v12 }
  0x69   : > { %711 = vmatpush.bf16.msra.mxu2 %v1969_v14 }
  0x6a   : > { %631 = vmatpush.bf16.msra.mxu0 %v2020_v31 }
  0x6b   : > { %699 = vmatpush.bf16.msra.mxu1 %v1995_v23 }
  0x6d   : > { %712 = vmatpush.bf16.msra.mxu2 %v2005_v26 }
  0x6e   : > { %632 = vmatpush.bf16.msra.mxu0 %v2048_v40 }
  0x6f   : > { %700 = vmatpush.bf16.msra.mxu1 %v2023_v32 }
  0x71   : > { %713 = vmatpush.bf16.msra.mxu2 %v2033_v35 }
  0x72   : > { %633 = vmatpush.bf16.msra.mxu0 %v2076_v49 }
  0x73   : > { %701 = vmatpush.bf16.msra.mxu1 %v2051_v41 }
  0x75   : > { %714 = vmatpush.bf16.msra.mxu2 %v2061_v44 }
  0x76   : > { %634 = vmatpush.bf16.msra.mxu0 %v2104_v58 }
  0x77   : > { %702 = vmatpush.bf16.msra.mxu1 %v2079_v50 }
  0x79   : > { %715 = vmatpush.bf16.msra.mxu2 %v2089_v53 }
  0x7a   : > { %635 = vmatpush.bf16.msra.mxu0 %v2132_v3 }
  0x7b   : > { %703 = vmatpush.bf16.msra.mxu1 %v2107_v59 }
  0x7d   : > { %716 = vmatpush.bf16.msra.mxu2 %v2117_v62 }
  0x7e   : > { %636 = vmatpush.bf16.msra.mxu0 %v2148_v13 }
  0x7f   : > { %704 = vmatpush.bf16.msra.mxu1 %v2135_v5 }
  0x81   : > { %717 = vmatpush.bf16.msra.mxu2 %v2145_v10 }
  0xbe   : > { %v427_v18 = vpop.f32.mrf.mxu0 }
  0xbf   : > { %v428_v19 = vadd.f32 %v427_v18, %v287_v16 }
  0xc1   : > { %v440_v20 = vpop.f32.mrf.mxu1  ;;  %v1462_v24 = vmul.f32 -1.442695, %v428_v19 }
  0xc2   : > { %v441_v21 = vadd.f32 %v440_v20, %v288_v17 }
  0xc3   : > { %1611 = vpow2.f32 %v1462_v24  ;;  %v1465_v24 = vld [vmem:[%s1921_s11 + $0x20] sm:$0xff] }
  0xc4   : > { %v1463_v25 = vmul.f32 -1.442695, %v441_v21 }
  0xc6   : > { %1613 = vpow2.f32 %v1463_v25  ;;  %v429_v28 = vpop.f32.mrf.mxu0  ;;  %v1466_v25 = vld [vmem:[%s1921_s11 + $0x28] sm:$0xff] }
  0xc7   : > { %v453_v30 = vpop.f32.mrf.mxu2 }
  0xc8   : > { %v454_v33 = vadd.f32 %v453_v30, %v289_v27 }
  0xc9   : > { %v442_v29 = vpop.f32.mrf.mxu1  ;;  %v1612_v34 = vpop.eup %1611 }
  0xca   : > { %v460_v37 = vadd.f32 1.0, %v1612_v34  ;;  %1615 = vtanh.f32 %v454_v33  ;;  %v1464_v34 = vld [vmem:[%s1921_s11 + $0x18] sm:$0xff] }
  0xcc   : > { %v1614_v36 = vpop.eup %1613  ;;  %1617 = vrcp.f32 %v460_v37  ;;  %v472_v52 = vand.u32 2147483648, %v460_v37  ;;  %v470_v57 = vand.u32 2147483647, %v460_v37  ;;  %vm466_vm3 = vweird.f32 %v460_v37 }
  0xcd   : > { %v479_v38 = vadd.f32 1.0, %v1614_v36 }
  0xce   : > { %v473_v2 = vor.u32 1.1754944e-38, %v472_v52  ;;  %vm471_vm5 = vcmp.eq.f32.partialorder %v470_v57, 8.507059e+37 }
  0xcf   : > { %1619 = vrcp.f32 %v479_v38  ;;  %v455_v39 = vpop.f32.mrf.mxu2  ;;  %v491_v51 = vand.u32 2147483648, %v479_v38  ;;  %vm485_vm1 = vweird.f32 %v479_v38  ;;  %v489_v61 = vand.u32 2147483647, %v479_v38 }
  0xd0   : > { %v1616_v42 = vpop.eup %1615 }
  0xd1   : > { %503 = vst [vmem:[%s1927_s14] sm:$0xff] %v1616_v42  ;;  %v496_v0 = vsub.f32 %v285_v54, %v1616_v42  ;;  %v492_v1 = vor.u32 1.1754944e-38, %v491_v51  ;;  %vm490_vm7 = vcmp.eq.f32.partialorder %v489_v61, 8.507059e+37 }
  0xd2   : > { %v1618_v43 = vpop.eup %1617 }
  0xd3   : > { %v462_v46 = vmul.f32 %v1618_v43, %v460_v37  ;;  %vm467_vm0 = vweird.f32 %v1618_v43 }
  0xd4   : > { %vm468_vm4 = vmor %vm466_vm3, %vm467_vm0 }
  0xd5   : > { %v1620_v45 = vpop.eup %1619  ;;  %v463_v48 = vsub.f32 1.0, %v462_v46 }
  0xd6   : > { %v481_v47 = vmul.f32 %v1620_v45, %v479_v38  ;;  %vm486_vm2 = vweird.f32 %v1620_v45 }
  0xd7   : > { %v464_v56 = vmul.f32 %v1618_v43, %v463_v48  ;;  %vm487_vm6 = vmor %vm485_vm1, %vm486_vm2 }
  0xd8   : > { %v482_v55 = vsub.f32 1.0, %v481_v47 }
  0xd9   : > { %v465_v63 = vadd.f32 %v1618_v43, %v464_v56 }
  0xda   : > { %v483_v60 = vmul.f32 %v1620_v45, %v482_v55 }
  0xdb   : > { %v469_v7 = vsel %vm468_vm4, %v1618_v43, %v465_v63 }
  0xdc   : > { %v484_v6 = vadd.f32 %v1620_v45, %v483_v60  ;;  %v474_v9 = vsel %vm471_vm5, %v473_v2, %v469_v7 }
  0xdd   : > { %v497_v17 = vmul.f32 %v496_v0, %v474_v9  ;;  %501 = vst [vmem:[%s1923_s12] sm:$0xff] %v474_v9 }
  0xde   : > { %v488_v11 = vsel %vm487_vm6, %v1620_v45, %v484_v6 }
  0xdf   : > { %v493_v16 = vsel %vm490_vm7, %v492_v1, %v488_v11  ;;  %v2216_v18 = vadd.f32 %v1616_v42, %v497_v17 }
  0xe0   : > { %502 = vst [vmem:[%s1925_s13] sm:$0xff] %v493_v16 }
  0xe1   : > { %1621 = vtanh.f32 %v2216_v18 }
  0xe7   : > { %v1622_v19 = vpop.eup %1621 }
  0xe8   : > { %v500_v20 = vmul.f32 %v1622_v19, %v493_v16 }
  0xea   : > { %v504_v21 = vpack.c.bf16 %v500_v20, %v500_v20 }
  0xec   : > { %517 = vmatmul.bf16.vlgmr.msra.gmra.mxu3 %v504_v21  ;;  %530 = vmatmul.bf16.vlgmr.msrb.gmra.mxu0 %v504_v21 }
  0xed   : > { %543 = vmatmul.bf16.vlgmr.msrb.gmra.mxu1 %v504_v21  ;;  %723 = vmatpush.bf16.msra.mxu3 %v1971_v15 }
  0xee   : > { %791 = vmatpush.bf16.msrb.mxu0 %v1939_v4  ;;  %804 = vmatpush.bf16.msrb.mxu1 %v1950_v8 }
  0xf1   : > { %724 = vmatpush.bf16.msra.mxu3 %v1992_v22 }
  0xf2   : > { %792 = vmatpush.bf16.msrb.mxu0 %v1962_v12  ;;  %805 = vmatpush.bf16.msrb.mxu1 %v1969_v14 }
  0xf5   : > { %725 = vmatpush.bf16.msra.mxu3 %v2020_v31 }
  0xf6   : > { %793 = vmatpush.bf16.msrb.mxu0 %v1995_v23  ;;  %806 = vmatpush.bf16.msrb.mxu1 %v2005_v26 }
  0xf9   : > { %726 = vmatpush.bf16.msra.mxu3 %v2048_v40 }
  0xfa   : > { %794 = vmatpush.bf16.msrb.mxu0 %v2023_v32  ;;  %807 = vmatpush.bf16.msrb.mxu1 %v2033_v35 }
  0xfd   : > { %727 = vmatpush.bf16.msra.mxu3 %v2076_v49 }
  0xfe   : > { %795 = vmatpush.bf16.msrb.mxu0 %v2051_v41  ;;  %808 = vmatpush.bf16.msrb.mxu1 %v2061_v44 }
 0x101   : > { %728 = vmatpush.bf16.msra.mxu3 %v2104_v58 }
 0x102   : > { %796 = vmatpush.bf16.msrb.mxu0 %v2079_v50  ;;  %809 = vmatpush.bf16.msrb.mxu1 %v2089_v53 }
 0x105   : > { %729 = vmatpush.bf16.msra.mxu3 %v2132_v3 }
 0x106   : > { %797 = vmatpush.bf16.msrb.mxu0 %v2107_v59  ;;  %810 = vmatpush.bf16.msrb.mxu1 %v2117_v62 }
 0x109   : > { %730 = vmatpush.bf16.msra.mxu3 %v2148_v13 }
 0x10a   : > { %798 = vmatpush.bf16.msrb.mxu0 %v2135_v5  ;;  %811 = vmatpush.bf16.msrb.mxu1 %v2145_v10 }
 0x169   : > { %v531_v27 = vpop.f32.mrf.mxu0 }
 0x16a   : > { %v532_v28 = vadd.f32 %v1465_v24, %v531_v27  ;;  %v544_v29 = vpop.f32.mrf.mxu1 }
 0x16b   : > { %v545_v30 = vadd.f32 %v1466_v25, %v544_v29 }
 0x16c   : > { %v1468_v33 = vmul.f32 -1.442695, %v532_v28 }
 0x16d   : > { %1623 = vtanh.f32 %v545_v30 }
 0x16e   : > { %1625 = vpow2.f32 %v1468_v33 }
 0x16f   : > { %v518_v36 = vpop.f32.mrf.mxu3 }
 0x170   : > { %v519_v37 = vadd.f32 %v1464_v34, %v518_v36  ;;  %v1472_v36 = vld [vmem:[%s1921_s11 + $0x30] sm:$0xff] }
 0x171   : > { %v533_v38 = vpop.f32.mrf.mxu0 }
 0x172   : > { %v1467_v39 = vmul.f32 -1.442695, %v519_v37  ;;  %v546_v42 = vpop.f32.mrf.mxu1  ;;  %v1473_v37 = vld [vmem:[%s1921_s11 + $0x38] sm:$0xff] }
 0x173   : > { %v1624_v43 = vpop.eup %1623 }
 0x174   : > { %v1626_v45 = vpop.eup %1625  ;;  %1471 = vst [vmem:[%s1927_s14 + $0x8] sm:$0xff] %v1624_v43  ;;  %1627 = vpow2.f32 %v1467_v39  ;;  %v587_v20 = vsub.f32 %v2216_v18, %v1624_v43  ;;  %v1474_v18 = vld [vmem:[%s1921_s11 + $0x40] sm:$0xff] }
 0x175   : > { %v570_v46 = vadd.f32 1.0, %v1626_v45 }
 0x177   : > { %1629 = vrcp.f32 %v570_v46  ;;  %v520_v47 = vpop.f32.mrf.mxu3  ;;  %v582_v56 = vand.u32 2147483648, %v570_v46  ;;  %v580_v60 = vand.u32 2147483647, %v570_v46  ;;  %vm576_vm9 = vweird.f32 %v570_v46 }
 0x179   : > { %v583_v1 = vor.u32 1.1754944e-38, %v582_v56  ;;  %vm581_vm11 = vcmp.eq.f32.partialorder %v580_v60, 8.507059e+37 }
 0x17a   : > { %v1628_v48 = vpop.eup %1627 }
 0x17b   : > { %v551_v51 = vadd.f32 1.0, %v1628_v48 }
 0x17d   : > { %v1630_v52 = vpop.eup %1629  ;;  %1631 = vrcp.f32 %v551_v51  ;;  %v563_v7 = vand.u32 2147483648, %v551_v51  ;;  %v561_v16 = vand.u32 2147483647, %v551_v51  ;;  %vm557_vm13 = vweird.f32 %v551_v51 }
 0x17e   : > { %v572_v54 = vmul.f32 %v1630_v52, %v570_v46  ;;  %vm577_vm8 = vweird.f32 %v1630_v52 }
 0x17f   : > { %vm578_vm10 = vmor %vm576_vm9, %vm577_vm8  ;;  %v564_v19 = vor.u32 1.1754944e-38, %v563_v7  ;;  %vm562_vm15 = vcmp.eq.f32.partialorder %v561_v16, 8.507059e+37 }
 0x180   : > { %v573_v55 = vsub.f32 1.0, %v572_v54 }
 0x182   : > { %v574_v57 = vmul.f32 %v1630_v52, %v573_v55 }
 0x183   : > { %v1632_v61 = vpop.eup %1631 }
 0x184   : > { %v553_v63 = vmul.f32 %v1632_v61, %v551_v51  ;;  %v575_v0 = vadd.f32 %v1630_v52, %v574_v57  ;;  %vm558_vm12 = vweird.f32 %v1632_v61 }
 0x185   : > { %vm559_vm14 = vmor %vm557_vm13, %vm558_vm12 }
 0x186   : > { %v554_v2 = vsub.f32 1.0, %v553_v63  ;;  %v579_v6 = vsel %vm578_vm10, %v1630_v52, %v575_v0 }
 0x187   : > { %v584_v9 = vsel %vm581_vm11, %v583_v1, %v579_v6 }
 0x188   : > { %v555_v11 = vmul.f32 %v1632_v61, %v554_v2  ;;  %1470 = vst [vmem:[%s1925_s13 + $0x8] sm:$0xff] %v584_v9 }
 0x18a   : > { %v556_v17 = vadd.f32 %v1632_v61, %v555_v11 }
 0x18c   : > { %v560_v21 = vsel %vm559_vm14, %v1632_v61, %v556_v17 }
 0x18d   : > { %v565_v24 = vsel %vm562_vm15, %v564_v19, %v560_v21 }
 0x18e   : > { %v588_v25 = vmul.f32 %v587_v20, %v565_v24  ;;  %1469 = vst [vmem:[%s1923_s12 + $0x8] sm:$0xff] %v565_v24 }
 0x190   : > { %v2250_v27 = vadd.f32 %v1624_v43, %v588_v25 }
 0x192   : > { %1633 = vtanh.f32 %v2250_v27 }
 0x198   : > { %v1634_v28 = vpop.eup %1633 }
 0x199   : > { %v591_v29 = vmul.f32 %v1634_v28, %v584_v9 }
 0x19b   : > { %v598_v30 = vpack.c.bf16 %v591_v29, %v591_v29 }
 0x19d   : > { %611 = vmatmul.bf16.vlgmr.msrb.gmra.mxu2 %v598_v30  ;;  %624 = vmatmul.bf16.vlgmr.msrb.gmra.mxu3 %v598_v30 }
 0x19e   : > { %637 = vmatmul.bf16.vlgmr.msra.gmra.mxu0 %v598_v30  ;;  %817 = vmatpush.bf16.msrb.mxu2 %v1971_v15 }
 0x19f   : > { %885 = vmatpush.bf16.msrb.mxu3 %v1939_v4  ;;  %898 = vmatpush.bf16.msra.mxu0 %v1950_v8 }
 0x1a2   : > { %818 = vmatpush.bf16.msrb.mxu2 %v1992_v22 }
 0x1a3   : > { %886 = vmatpush.bf16.msrb.mxu3 %v1962_v12  ;;  %899 = vmatpush.bf16.msra.mxu0 %v1969_v14 }
 0x1a6   : > { %819 = vmatpush.bf16.msrb.mxu2 %v2020_v31 }
 0x1a7   : > { %887 = vmatpush.bf16.msrb.mxu3 %v1995_v23  ;;  %900 = vmatpush.bf16.msra.mxu0 %v2005_v26 }
 0x1aa   : > { %820 = vmatpush.bf16.msrb.mxu2 %v2048_v40 }
 0x1ab   : > { %888 = vmatpush.bf16.msrb.mxu3 %v2023_v32  ;;  %901 = vmatpush.bf16.msra.mxu0 %v2033_v35 }
 0x1ae   : > { %821 = vmatpush.bf16.msrb.mxu2 %v2076_v49 }
 0x1af   : > { %889 = vmatpush.bf16.msrb.mxu3 %v2051_v41  ;;  %902 = vmatpush.bf16.msra.mxu0 %v2061_v44 }
 0x1b2   : > { %822 = vmatpush.bf16.msrb.mxu2 %v2104_v58 }
 0x1b3   : > { %890 = vmatpush.bf16.msrb.mxu3 %v2079_v50  ;;  %903 = vmatpush.bf16.msra.mxu0 %v2089_v53 }
 0x1b6   : > { %823 = vmatpush.bf16.msrb.mxu2 %v2132_v3 }
 0x1b7   : > { %891 = vmatpush.bf16.msrb.mxu3 %v2107_v59  ;;  %904 = vmatpush.bf16.msra.mxu0 %v2117_v62 }
 0x1ba   : > { %824 = vmatpush.bf16.msrb.mxu2 %v2148_v13 }
 0x1bb   : > { %892 = vmatpush.bf16.msrb.mxu3 %v2135_v5  ;;  %905 = vmatpush.bf16.msra.mxu0 %v2145_v10 }
 0x21b   : > { %v638_v33 = vpop.f32.mrf.mxu0 }
 0x21c   : > { %v639_v34 = vadd.f32 %v1474_v18, %v638_v33 }
 0x21e   : > { %1635 = vtanh.f32 %v639_v34 }
 0x220   : > { %v612_v38 = vpop.f32.mrf.mxu2  ;;  %v625_v39 = vpop.f32.mrf.mxu3 }
 0x221   : > { %v613_v42 = vadd.f32 %v1472_v36, %v612_v38  ;;  %v626_v43 = vadd.f32 %v1473_v37, %v625_v39 }
 0x223   : > { %v1475_v45 = vmul.f32 -1.442695, %v613_v42  ;;  %v1476_v46 = vmul.f32 -1.442695, %v626_v43  ;;  %v640_v47 = vpop.f32.mrf.mxu0 }
 0x224   : > { %v1636_v48 = vpop.eup %1635 }
 0x225   : > { %1479 = vst [vmem:[%s1927_s14 + $0x10] sm:$0xff] %v1636_v48  ;;  %1637 = vpow2.f32 %v1475_v45  ;;  %v681_v24 = vsub.f32 %v2250_v27, %v1636_v48  ;;  %v1480_v27 = vld [vmem:[%s1921_s11 + $0x48] sm:$0xff]  ;;  %v1481_v45 = vld [vmem:[%s1921_s11 + $0x50] sm:$0xff] }
 0x226   : > { %1639 = vpow2.f32 %v1476_v46  ;;  %v1482_v46 = vld [vmem:[%s1921_s11 + $0x58] sm:$0xff] }
 0x228   : > { %v614_v51 = vpop.f32.mrf.mxu2  ;;  %v627_v52 = vpop.f32.mrf.mxu3 }
 0x22b   : > { %v1638_v54 = vpop.eup %1637 }
 0x22c   : > { %v1640_v55 = vpop.eup %1639  ;;  %v645_v56 = vadd.f32 1.0, %v1638_v54 }
 0x22d   : > { %v664_v57 = vadd.f32 1.0, %v1640_v55 }
 0x22e   : > { %1641 = vrcp.f32 %v645_v56  ;;  %v657_v2 = vand.u32 2147483648, %v645_v56  ;;  %v655_v9 = vand.u32 2147483647, %v645_v56  ;;  %vm651_vm2 = vweird.f32 %v645_v56 }
 0x22f   : > { %1643 = vrcp.f32 %v664_v57  ;;  %v676_v11 = vand.u32 2147483648, %v664_v57  ;;  %v674_v17 = vand.u32 2147483647, %v664_v57  ;;  %vm670_vm4 = vweird.f32 %v664_v57 }
 0x230   : > { %v658_v20 = vor.u32 1.1754944e-38, %v657_v2  ;;  %vm656_vm5 = vcmp.eq.f32.partialorder %v655_v9, 8.507059e+37 }
 0x231   : > { %v677_v28 = vor.u32 1.1754944e-38, %v676_v11  ;;  %vm675_vm7 = vcmp.eq.f32.partialorder %v674_v17, 8.507059e+37 }
 0x234   : > { %v1642_v60 = vpop.eup %1641 }
 0x235   : > { %v1644_v61 = vpop.eup %1643  ;;  %v647_v63 = vmul.f32 %v1642_v60, %v645_v56  ;;  %vm652_vm0 = vweird.f32 %v1642_v60 }
 0x236   : > { %v666_v0 = vmul.f32 %v1644_v61, %v664_v57  ;;  %vm671_vm1 = vweird.f32 %v1644_v61  ;;  %vm653_vm3 = vmor %vm651_vm2, %vm652_vm0 }
 0x237   : > { %v648_v1 = vsub.f32 1.0, %v647_v63  ;;  %vm672_vm6 = vmor %vm670_vm4, %vm671_vm1 }
 0x238   : > { %v667_v6 = vsub.f32 1.0, %v666_v0 }
 0x239   : > { %v649_v7 = vmul.f32 %v1642_v60, %v648_v1 }
 0x23a   : > { %v668_v16 = vmul.f32 %v1644_v61, %v667_v6 }
 0x23b   : > { %v650_v19 = vadd.f32 %v1642_v60, %v649_v7 }
 0x23c   : > { %v669_v21 = vadd.f32 %v1644_v61, %v668_v16 }
 0x23d   : > { %v654_v25 = vsel %vm653_vm3, %v1642_v60, %v650_v19 }
 0x23e   : > { %v659_v29 = vsel %vm656_vm5, %v658_v20, %v654_v25  ;;  %v673_v30 = vsel %vm672_vm6, %v1644_v61, %v669_v21 }
 0x23f   : > { %1477 = vst [vmem:[%s1923_s12 + $0x10] sm:$0xff] %v659_v29  ;;  %v678_v18 = vsel %vm675_vm7, %v677_v28, %v673_v30  ;;  %v682_v33 = vmul.f32 %v681_v24, %v659_v29 }
 0x240   : > { %1478 = vst [vmem:[%s1925_s13 + $0x10] sm:$0xff] %v678_v18 }
 0x241   : > { %v2284_v34 = vadd.f32 %v1636_v48, %v682_v33 }
 0x243   : > { %1645 = vtanh.f32 %v2284_v34 }
 0x249   : > { %v1646_v36 = vpop.eup %1645 }
 0x24a   : > { %v685_v37 = vmul.f32 %v1646_v36, %v678_v18 }
 0x24c   : > { %v692_v38 = vpack.c.bf16 %v685_v37, %v685_v37 }
 0x24e   : > { %705 = vmatmul.bf16.vlgmr.msra.gmra.mxu1 %v692_v38  ;;  %718 = vmatmul.bf16.vlgmr.msra.gmra.mxu2 %v692_v38 }
 0x24f   : > { %731 = vmatmul.bf16.vlgmr.msra.gmra.mxu3 %v692_v38  ;;  %911 = vmatpush.bf16.msra.mxu1 %v1971_v15 }
 0x250   : > { %979 = vmatpush.bf16.msra.mxu2 %v1939_v4  ;;  %992 = vmatpush.bf16.msra.mxu3 %v1950_v8 }
 0x253   : > { %912 = vmatpush.bf16.msra.mxu1 %v1992_v22 }
 0x254   : > { %980 = vmatpush.bf16.msra.mxu2 %v1962_v12  ;;  %993 = vmatpush.bf16.msra.mxu3 %v1969_v14 }
 0x257   : > { %913 = vmatpush.bf16.msra.mxu1 %v2020_v31 }
 0x258   : > { %981 = vmatpush.bf16.msra.mxu2 %v1995_v23  ;;  %994 = vmatpush.bf16.msra.mxu3 %v2005_v26 }
 0x25b   : > { %914 = vmatpush.bf16.msra.mxu1 %v2048_v40 }
 0x25c   : > { %982 = vmatpush.bf16.msra.mxu2 %v2023_v32  ;;  %995 = vmatpush.bf16.msra.mxu3 %v2033_v35 }
 0x25f   : > { %915 = vmatpush.bf16.msra.mxu1 %v2076_v49 }
 0x260   : > { %983 = vmatpush.bf16.msra.mxu2 %v2051_v41  ;;  %996 = vmatpush.bf16.msra.mxu3 %v2061_v44 }
 0x263   : > { %916 = vmatpush.bf16.msra.mxu1 %v2104_v58 }
 0x264   : > { %984 = vmatpush.bf16.msra.mxu2 %v2079_v50  ;;  %997 = vmatpush.bf16.msra.mxu3 %v2089_v53 }
 0x267   : > { %917 = vmatpush.bf16.msra.mxu1 %v2132_v3 }
 0x268   : > { %985 = vmatpush.bf16.msra.mxu2 %v2107_v59  ;;  %998 = vmatpush.bf16.msra.mxu3 %v2117_v62 }
 0x26b   : > { %918 = vmatpush.bf16.msra.mxu1 %v2148_v13 }
 0x26c   : > { %986 = vmatpush.bf16.msra.mxu2 %v2135_v5  ;;  %999 = vmatpush.bf16.msra.mxu3 %v2145_v10 }
 0x2cb   : > { %v706_v39 = vpop.f32.mrf.mxu1 }
 0x2cc   : > { %v707_v42 = vadd.f32 %v1480_v27, %v706_v39 }
 0x2ce   : > { %v1483_v43 = vmul.f32 -1.442695, %v707_v42 }
 0x2d0   : > { %1647 = vpow2.f32 %v1483_v43 }
 0x2d1   : > { %v719_v47 = vpop.f32.mrf.mxu2 }
 0x2d2   : > { %v720_v48 = vadd.f32 %v1481_v45, %v719_v47  ;;  %v732_v51 = vpop.f32.mrf.mxu3 }
 0x2d3   : > { %v733_v52 = vadd.f32 %v1482_v46, %v732_v51  ;;  %v708_v54 = vpop.f32.mrf.mxu1 }
 0x2d4   : > { %v1484_v55 = vmul.f32 -1.442695, %v720_v48 }
 0x2d5   : > { %1649 = vtanh.f32 %v733_v52 }
 0x2d6   : > { %v1648_v56 = vpop.eup %1647  ;;  %1651 = vpow2.f32 %v1484_v55 }
 0x2d7   : > { %v739_v57 = vadd.f32 1.0, %v1648_v56 }
 0x2d9   : > { %1653 = vrcp.f32 %v739_v57  ;;  %v721_v60 = vpop.f32.mrf.mxu2  ;;  %v751_v9 = vand.u32 2147483648, %v739_v57  ;;  %v749_v16 = vand.u32 2147483647, %v739_v57  ;;  %vm745_vm9 = vweird.f32 %v739_v57 }
 0x2da   : > { %v734_v61 = vpop.f32.mrf.mxu3 }
 0x2db   : > { %v1650_v63 = vpop.eup %1649  ;;  %v752_v21 = vor.u32 1.1754944e-38, %v751_v9  ;;  %vm750_vm11 = vcmp.eq.f32.partialorder %v749_v16, 8.507059e+37 }
 0x2dc   : > { %v1652_v0 = vpop.eup %1651  ;;  %1487 = vst [vmem:[%s1927_s14 + $0x18] sm:$0xff] %v1650_v63  ;;  %v775_v28 = vsub.f32 %v2284_v34, %v1650_v63 }
 0x2dd   : > { %v758_v1 = vadd.f32 1.0, %v1652_v0 }
 0x2df   : > { %v1654_v2 = vpop.eup %1653  ;;  %1655 = vrcp.f32 %v758_v1  ;;  %v770_v30 = vand.u32 2147483648, %v758_v1  ;;  %v768_v36 = vand.u32 2147483647, %v758_v1  ;;  %vm764_vm13 = vweird.f32 %v758_v1 }
 0x2e0   : > { %v741_v6 = vmul.f32 %v1654_v2, %v739_v57  ;;  %vm746_vm8 = vweird.f32 %v1654_v2 }
 0x2e1   : > { %vm747_vm10 = vmor %vm745_vm9, %vm746_vm8  ;;  %v771_v27 = vor.u32 1.1754944e-38, %v770_v30  ;;  %vm769_vm15 = vcmp.eq.f32.partialorder %v768_v36, 8.507059e+37 }
 0x2e2   : > { %v742_v7 = vsub.f32 1.0, %v741_v6 }
 0x2e4   : > { %v743_v11 = vmul.f32 %v1654_v2, %v742_v7 }
 0x2e5   : > { %v1656_v17 = vpop.eup %1655 }
 0x2e6   : > { %v744_v19 = vadd.f32 %v1654_v2, %v743_v11  ;;  %v760_v20 = vmul.f32 %v1656_v17, %v758_v1  ;;  %vm765_vm12 = vweird.f32 %v1656_v17 }
 0x2e7   : > { %vm766_vm14 = vmor %vm764_vm13, %vm765_vm12 }
 0x2e8   : > { %v748_v24 = vsel %vm747_vm10, %v1654_v2, %v744_v19  ;;  %v761_v25 = vsub.f32 1.0, %v760_v20 }
 0x2e9   : > { %v753_v29 = vsel %vm750_vm11, %v752_v21, %v748_v24 }
 0x2ea   : > { %1485 = vst [vmem:[%s1923_s12 + $0x18] sm:$0xff] %v753_v29  ;;  %v776_v18 = vmul.f32 %v775_v28, %v753_v29  ;;  %v762_v33 = vmul.f32 %v1656_v17, %v761_v25 }
 0x2ec   : > { %v2317_v37 = vadd.f32 %v1650_v63, %v776_v18  ;;  %v763_v38 = vadd.f32 %v1656_v17, %v762_v33  ;;  %v1497_v18 = vld [vmem:[%s1921_s11 + $0x80] sm:$0xff]  ;;  %v1498_v33 = vld [vmem:[%s1921_s11 + $0x88] sm:$0xff] }
 0x2ee   : > { %v767_v39 = vsel %vm766_vm14, %v1656_v17, %v763_v38  ;;  %1657 = vtanh.f32 %v2317_v37 }
 0x2ef   : > { %v772_v42 = vsel %vm769_vm15, %v771_v27, %v767_v39 }
 0x2f0   : > { %1486 = vst [vmem:[%s1925_s13 + $0x18] sm:$0xff] %v772_v42 }
 0x2f4   : > { %v1658_v34 = vpop.eup %1657 }
 0x2f5   : > { %v779_v43 = vmul.f32 %v1658_v34, %v772_v42 }
 0x2f7   : > { %v786_v45 = vpack.c.bf16 %v779_v43, %v779_v43 }
 0x2f9   : > { %799 = vmatmul.bf16.vlgmr.msrb.gmra.mxu0 %v786_v45  ;;  %812 = vmatmul.bf16.vlgmr.msrb.gmra.mxu1 %v786_v45 }
 0x2fa   : > { %825 = vmatmul.bf16.vlgmr.msrb.gmra.mxu2 %v786_v45  ;;  %1005 = vmatpush.bf16.msrb.mxu0 %v1971_v15 }
 0x2fb   : > { %1073 = vmatpush.bf16.msrb.mxu1 %v1939_v4  ;;  %1086 = vmatpush.bf16.msrb.mxu2 %v1950_v8  ;;  %v1488_v4 = vld [vmem:[%s1921_s11 + $0x60] sm:$0xff]  ;;  %v1489_v8 = vld [vmem:[%s1921_s11 + $0x68] sm:$0xff] }
 0x2fe   : > { %1006 = vmatpush.bf16.msrb.mxu0 %v1992_v22 }
 0x2ff   : > { %1074 = vmatpush.bf16.msrb.mxu1 %v1962_v12  ;;  %1087 = vmatpush.bf16.msrb.mxu2 %v1969_v14 }
 0x302   : > { %1007 = vmatpush.bf16.msrb.mxu0 %v2020_v31 }
 0x303   : > { %1075 = vmatpush.bf16.msrb.mxu1 %v1995_v23  ;;  %1088 = vmatpush.bf16.msrb.mxu2 %v2005_v26 }
 0x306   : > { %1008 = vmatpush.bf16.msrb.mxu0 %v2048_v40 }
 0x307   : > { %1076 = vmatpush.bf16.msrb.mxu1 %v2023_v32  ;;  %1089 = vmatpush.bf16.msrb.mxu2 %v2033_v35 }
 0x30a   : > { %1009 = vmatpush.bf16.msrb.mxu0 %v2076_v49 }
 0x30b   : > { %1077 = vmatpush.bf16.msrb.mxu1 %v2051_v41  ;;  %1090 = vmatpush.bf16.msrb.mxu2 %v2061_v44  ;;  %v1490_v41 = vld [vmem:[%s1921_s11 + $0x70] sm:$0xff] }
 0x30e   : > { %1010 = vmatpush.bf16.msrb.mxu0 %v2104_v58 }
 0x30f   : > { %1078 = vmatpush.bf16.msrb.mxu1 %v2079_v50  ;;  %1091 = vmatpush.bf16.msrb.mxu2 %v2089_v53 }
 0x312   : > { %1011 = vmatpush.bf16.msrb.mxu0 %v2132_v3 }
 0x313   : > { %1079 = vmatpush.bf16.msrb.mxu1 %v2107_v59  ;;  %1092 = vmatpush.bf16.msrb.mxu2 %v2117_v62 }
 0x316   : > { %1012 = vmatpush.bf16.msrb.mxu0 %v2148_v13 }
 0x317   : > { %1080 = vmatpush.bf16.msrb.mxu1 %v2135_v5  ;;  %1093 = vmatpush.bf16.msrb.mxu2 %v2145_v10 }
 0x376   : > { %v800_v12 = vpop.f32.mrf.mxu0  ;;  %v813_v14 = vpop.f32.mrf.mxu1 }
 0x377   : > { %v801_v23 = vadd.f32 %v1488_v4, %v800_v12  ;;  %v814_v26 = vadd.f32 %v1489_v8, %v813_v14 }
 0x379   : > { %v1491_v32 = vmul.f32 -1.442695, %v801_v23  ;;  %v1492_v35 = vmul.f32 -1.442695, %v814_v26 }
 0x37b   : > { %1659 = vpow2.f32 %v1491_v32 }
 0x37c   : > { %1661 = vpow2.f32 %v1492_v35 }
 0x37d   : > { %v826_v44 = vpop.f32.mrf.mxu2 }
 0x37e   : > { %v827_v50 = vadd.f32 %v1490_v41, %v826_v44  ;;  %v802_v53 = vpop.f32.mrf.mxu0  ;;  %v815_v59 = vpop.f32.mrf.mxu1 }
 0x380   : > { %1663 = vtanh.f32 %v827_v50 }
 0x381   : > { %v1660_v62 = vpop.eup %1659 }
 0x382   : > { %v1662_v5 = vpop.eup %1661  ;;  %v833_v10 = vadd.f32 1.0, %v1660_v62 }
 0x383   : > { %v852_v46 = vadd.f32 1.0, %v1662_v5 }
 0x384   : > { %1665 = vrcp.f32 %v833_v10  ;;  %v845_v57 = vand.u32 2147483648, %v833_v10  ;;  %v843_v63 = vand.u32 2147483647, %v833_v10  ;;  %vm839_vm2 = vweird.f32 %v833_v10 }
 0x385   : > { %1667 = vrcp.f32 %v852_v46  ;;  %v828_v47 = vpop.f32.mrf.mxu2  ;;  %v864_v0 = vand.u32 2147483648, %v852_v46  ;;  %v862_v2 = vand.u32 2147483647, %v852_v46  ;;  %vm858_vm4 = vweird.f32 %v852_v46 }
 0x386   : > { %v1664_v48 = vpop.eup %1663  ;;  %v846_v7 = vor.u32 1.1754944e-38, %v845_v57  ;;  %vm844_vm5 = vcmp.eq.f32.partialorder %v843_v63, 8.507059e+37 }
 0x387   : > { %1495 = vst [vmem:[%s1927_s14 + $0x20] sm:$0xff] %v1664_v48  ;;  %v869_v16 = vsub.f32 %v2317_v37, %v1664_v48  ;;  %v865_v17 = vor.u32 1.1754944e-38, %v864_v0  ;;  %vm863_vm7 = vcmp.eq.f32.partialorder %v862_v2, 8.507059e+37  ;;  %v1505_v2 = vld [vmem:[%s1921_s11 + $0x98] sm:$0xff] }
 0x38a   : > { %v1666_v51 = vpop.eup %1665 }
 0x38b   : > { %v1668_v52 = vpop.eup %1667  ;;  %v835_v54 = vmul.f32 %v1666_v51, %v833_v10  ;;  %vm840_vm0 = vweird.f32 %v1666_v51 }
 0x38c   : > { %v854_v55 = vmul.f32 %v1668_v52, %v852_v46  ;;  %vm859_vm1 = vweird.f32 %v1668_v52  ;;  %vm841_vm3 = vmor %vm839_vm2, %vm840_vm0 }
 0x38d   : > { %v836_v56 = vsub.f32 1.0, %v835_v54  ;;  %vm860_vm6 = vmor %vm858_vm4, %vm859_vm1 }
 0x38e   : > { %v855_v60 = vsub.f32 1.0, %v854_v55 }
 0x38f   : > { %v837_v61 = vmul.f32 %v1666_v51, %v836_v56 }
 0x390   : > { %v856_v1 = vmul.f32 %v1668_v52, %v855_v60 }
 0x391   : > { %v838_v6 = vadd.f32 %v1666_v51, %v837_v61  ;;  %v1506_v61 = vld [vmem:[%s1921_s11 + $0xa0] sm:$0xff] }
 0x392   : > { %v857_v9 = vadd.f32 %v1668_v52, %v856_v1  ;;  %v1504_v1 = vld [vmem:[%s1921_s11 + $0x90] sm:$0xff] }
 0x393   : > { %v842_v11 = vsel %vm841_vm3, %v1666_v51, %v838_v6 }
 0x394   : > { %v847_v19 = vsel %vm844_vm5, %v846_v7, %v842_v11  ;;  %v861_v20 = vsel %vm860_vm6, %v1668_v52, %v857_v9 }
 0x395   : > { %1493 = vst [vmem:[%s1923_s12 + $0x20] sm:$0xff] %v847_v19  ;;  %v870_v21 = vmul.f32 %v869_v16, %v847_v19  ;;  %v866_v24 = vsel %vm863_vm7, %v865_v17, %v861_v20 }
 0x396   : > { %1494 = vst [vmem:[%s1925_s13 + $0x20] sm:$0xff] %v866_v24 }
 0x397   : > { %v2352_v25 = vadd.f32 %v1664_v48, %v870_v21 }
 0x399   : > { %1669 = vtanh.f32 %v2352_v25 }
 0x39f   : > { %v1670_v28 = vpop.eup %1669 }
 0x3a0   : > { %v873_v29 = vmul.f32 %v1670_v28, %v866_v24 }
 0x3a2   : > { %v880_v30 = vpack.c.bf16 %v873_v29, %v873_v29 }
 0x3a4   : > { %893 = vmatmul.bf16.vlgmr.msrb.gmra.mxu3 %v880_v30  ;;  %906 = vmatmul.bf16.vlgmr.msra.gmra.mxu0 %v880_v30 }
 0x3a5   : > { %919 = vmatmul.bf16.vlgmr.msra.gmra.mxu1 %v880_v30  ;;  %1099 = vmatpush.bf16.msrb.mxu3 %v1971_v15 }
 0x3a9   : > { %1100 = vmatpush.bf16.msrb.mxu3 %v1992_v22 }
 0x3ad   : > { %1101 = vmatpush.bf16.msrb.mxu3 %v2020_v31  ;;  %v1496_v31 = vld [vmem:[%s1921_s11 + $0x78] sm:$0xff] }
 0x3b1   : > { %1102 = vmatpush.bf16.msrb.mxu3 %v2048_v40 }
 0x3b5   : > { %1103 = vmatpush.bf16.msrb.mxu3 %v2076_v49 }
 0x3b9   : > { %1104 = vmatpush.bf16.msrb.mxu3 %v2104_v58 }
 0x3bd   : > { %1105 = vmatpush.bf16.msrb.mxu3 %v2132_v3 }
 0x3c1   : > { %1106 = vmatpush.bf16.msrb.mxu3 %v2148_v13 }
 0x421   : > { %v907_v36 = vpop.f32.mrf.mxu0 }
 0x422   : > { %v908_v15 = vadd.f32 %v1497_v18, %v907_v36  ;;  %v920_v37 = vpop.f32.mrf.mxu1 }
 0x423   : > { %v921_v38 = vadd.f32 %v1498_v33, %v920_v37 }
 0x424   : > { %v1500_v22 = vmul.f32 -1.442695, %v908_v15 }
 0x425   : > { %1671 = vtanh.f32 %v921_v38 }
 0x426   : > { %1673 = vpow2.f32 %v1500_v22 }
 0x427   : > { %v894_v40 = vpop.f32.mrf.mxu3 }
 0x428   : > { %v895_v27 = vadd.f32 %v1496_v31, %v894_v40 }
 0x429   : > { %v909_v49 = vpop.f32.mrf.mxu0 }
 0x42a   : > { %v1499_v39 = vmul.f32 -1.442695, %v895_v27  ;;  %v922_v58 = vpop.f32.mrf.mxu1 }
 0x42b   : > { %v1672_v42 = vpop.eup %1671 }
 0x42c   : > { %v1674_v3 = vpop.eup %1673  ;;  %1503 = vst [vmem:[%s1927_s14 + $0x28] sm:$0xff] %v1672_v42  ;;  %1675 = vpow2.f32 %v1499_v39  ;;  %v963_v48 = vsub.f32 %v2352_v25, %v1672_v42 }
 0x42d   : > { %v946_v13 = vadd.f32 1.0, %v1674_v3 }
 0x42f   : > { %1677 = vrcp.f32 %v946_v13  ;;  %v896_v34 = vpop.f32.mrf.mxu3  ;;  %v958_v14 = vand.u32 2147483648, %v946_v13  ;;  %v956_v26 = vand.u32 2147483647, %v946_v13  ;;  %vm952_vm9 = vweird.f32 %v946_v13 }
 0x431   : > { %v959_v44 = vor.u32 1.1754944e-38, %v958_v14  ;;  %vm957_vm11 = vcmp.eq.f32.partialorder %v956_v26, 8.507059e+37 }
 0x432   : > { %v1676_v43 = vpop.eup %1675 }
 0x433   : > { %v927_v45 = vadd.f32 1.0, %v1676_v43 }
 0x435   : > { %v1678_v4 = vpop.eup %1677  ;;  %1679 = vrcp.f32 %v927_v45  ;;  %v939_v59 = vand.u32 2147483648, %v927_v45  ;;  %v937_v10 = vand.u32 2147483647, %v927_v45  ;;  %vm933_vm13 = vweird.f32 %v927_v45 }
 0x436   : > { %v948_v8 = vmul.f32 %v1678_v4, %v946_v13  ;;  %vm953_vm8 = vweird.f32 %v1678_v4 }
 0x437   : > { %vm954_vm10 = vmor %vm952_vm9, %vm953_vm8  ;;  %v940_v47 = vor.u32 1.1754944e-38, %v939_v59  ;;  %vm938_vm15 = vcmp.eq.f32.partialorder %v937_v10, 8.507059e+37  ;;  %v1514_v59 = vld [vmem:[%s1921_s11 + $0xb8] sm:$0xff] }
 0x438   : > { %v949_v12 = vsub.f32 1.0, %v948_v8 }
 0x43a   : > { %v950_v23 = vmul.f32 %v1678_v4, %v949_v12 }
 0x43b   : > { %v1680_v32 = vpop.eup %1679 }
 0x43c   : > { %v929_v35 = vmul.f32 %v1680_v32, %v927_v45  ;;  %v951_v41 = vadd.f32 %v1678_v4, %v950_v23  ;;  %vm934_vm12 = vweird.f32 %v1680_v32 }
 0x43d   : > { %vm935_vm14 = vmor %vm933_vm13, %vm934_vm12 }
 0x43e   : > { %v930_v50 = vsub.f32 1.0, %v929_v35  ;;  %v955_v53 = vsel %vm954_vm10, %v1678_v4, %v951_v41  ;;  %v1512_v35 = vld [vmem:[%s1921_s11 + $0xa8] sm:$0xff] }
 0x43f   : > { %v960_v62 = vsel %vm957_vm11, %v959_v44, %v955_v53  ;;  %v1513_v53 = vld [vmem:[%s1921_s11 + $0xb0] sm:$0xff]  ;;  %s2388_s11 = sshll.u32 %s1885_s22, 6 }
 0x440   : > { %v931_v5 = vmul.f32 %v1680_v32, %v930_v50  ;;  %1502 = vst [vmem:[%s1925_s13 + $0x28] sm:$0xff] %v960_v62  ;;  %s1187_s26 = scalar_lea.hbm %s2504_s2, %s2388_s11  ;;  %s1204_s10 = scalar_lea.hbm %s2505_s3, %s2388_s11 }
 0x441   : > { %s2395_s7 = sshll.u32 %s1187_s26, 4  ;;  %s1221_s25 = scalar_lea.hbm %s2506_s4, %s2388_s11  ;;  %s1191_s7 = int_to_ptr.hbm [resolvable:$true] %s2395_s7 }
 0x442   : > { %v932_v46 = vadd.f32 %v1680_v32, %v931_v5  ;;  %s2412_s30 = sshll.u32 %s1204_s10, 4  ;;  %s2514_s26 = sand.u32 1, %s1821_s19   ;;  %s1208_s30 = int_to_ptr.hbm [resolvable:$true] %s2412_s30 }
 0x443   : > { %s1166_s8 = scalar_lea.sflag [#allocation5], %s2514_s26  ;;  %s1721_s9 = sshra.s32 %s1191_s7, 4  ;;  %s1722_s9 = int_to_ptr.hbm [resolvable:$true] %s1721_s9 }
 0x444   : > { %v936_v51 = vsel %vm935_vm14, %v1680_v32, %v932_v46  ;;  %s1723_s0 = scalar_lea.hbm %s1722_s9, 64  ;;  %p1728_p1 = scmp.lt.s32.totalorder %s1722_s9, %s2504_s2 }
 0x445   : > { %v941_v52 = vsel %vm938_vm15, %v940_v47, %v936_v51  ;;  %p1724_p12 = scmp.ne.s32.totalorder %s1722_s9, %s1723_s0 }
 0x446   : > { %1501 = vst [vmem:[%s1923_s12 + $0x28] sm:$0xff] %v941_v52  ;;  %v964_v54 = vmul.f32 %v963_v48, %v941_v52 }
 0x447   : > { %p1725_p13 = pnand %p1724_p12, %p1904_p5 }
 0x448   : > { %v2370_v55 = vadd.f32 %v1672_v42, %v964_v54 }
 0x449   : > { %p1726_p0 = pneg %p1725_p13 }
 0x44a   : > { %1681 = vtanh.f32 %v2370_v55 }
 0x450   : > { %v1682_v56 = vpop.eup %1681 }
 0x451   : > { %v967_v57 = vmul.f32 %v1682_v56, %v960_v62 }
 0x453   : > { %v974_v60 = vpack.c.bf16 %v967_v57, %v967_v57 }
 0x455   : > { %987 = vmatmul.bf16.vlgmr.msra.gmra.mxu2 %v974_v60  ;;  %1000 = vmatmul.bf16.vlgmr.msra.gmra.mxu3 %v974_v60 }
 0x456   : > { %1013 = vmatmul.bf16.vlgmr.msrb.gmra.mxu0 %v974_v60 }
 0x4d3   : > { %v1014_v63 = vpop.f32.mrf.mxu0 }
 0x4d4   : > { %v1015_v0 = vadd.f32 %v1506_v61, %v1014_v63 }
 0x4d6   : > { %1683 = vtanh.f32 %v1015_v0 }
 0x4d8   : > { %v988_v6 = vpop.f32.mrf.mxu2  ;;  %v1001_v7 = vpop.f32.mrf.mxu3 }
 0x4d9   : > { %v989_v9 = vadd.f32 %v1504_v1, %v988_v6  ;;  %v1002_v11 = vadd.f32 %v1505_v2, %v1001_v7 }
 0x4db   : > { %v1507_v16 = vmul.f32 -1.442695, %v989_v9  ;;  %v1508_v17 = vmul.f32 -1.442695, %v1002_v11  ;;  %v1016_v19 = vpop.f32.mrf.mxu0 }
 0x4dc   : > { %v1684_v20 = vpop.eup %1683 }
 0x4dd   : > { %1511 = vst [vmem:[%s1927_s14 + $0x30] sm:$0xff] %v1684_v20  ;;  %1685 = vpow2.f32 %v1507_v16  ;;  %v1057_v13 = vsub.f32 %v2370_v55, %v1684_v20 }
 0x4de   : > { %1687 = vpow2.f32 %v1508_v17 }
 0x4e0   : > { %v990_v21 = vpop.f32.mrf.mxu2  ;;  %v1003_v24 = vpop.f32.mrf.mxu3 }
 0x4e3   : > { %v1686_v25 = vpop.eup %1685 }
 0x4e4   : > { %v1688_v28 = vpop.eup %1687  ;;  %v1021_v29 = vadd.f32 1.0, %v1686_v25 }
 0x4e5   : > { %v1040_v30 = vadd.f32 1.0, %v1688_v28 }
 0x4e6   : > { %1689 = vrcp.f32 %v1021_v29  ;;  %v1033_v38 = vand.u32 2147483648, %v1021_v29  ;;  %v1031_v40 = vand.u32 2147483647, %v1021_v29  ;;  %vm1027_vm2 = vweird.f32 %v1021_v29 }
 0x4e7   : > { %1691 = vrcp.f32 %v1040_v30  ;;  %v1052_v27 = vand.u32 2147483648, %v1040_v30  ;;  %v1050_v39 = vand.u32 2147483647, %v1040_v30  ;;  %vm1046_vm4 = vweird.f32 %v1040_v30 }
 0x4e8   : > { %v1034_v42 = vor.u32 1.1754944e-38, %v1033_v38  ;;  %vm1032_vm5 = vcmp.eq.f32.partialorder %v1031_v40, 8.507059e+37 }
 0x4e9   : > { %v1053_v43 = vor.u32 1.1754944e-38, %v1052_v27  ;;  %vm1051_vm7 = vcmp.eq.f32.partialorder %v1050_v39, 8.507059e+37 }
 0x4ec   : > { %v1690_v18 = vpop.eup %1689 }
 0x4ed   : > { %v1692_v33 = vpop.eup %1691  ;;  %v1023_v36 = vmul.f32 %v1690_v18, %v1021_v29  ;;  %vm1028_vm0 = vweird.f32 %v1690_v18 }
 0x4ee   : > { %v1042_v15 = vmul.f32 %v1692_v33, %v1040_v30  ;;  %vm1047_vm1 = vweird.f32 %v1692_v33  ;;  %vm1029_vm3 = vmor %vm1027_vm2, %vm1028_vm0 }
 0x4ef   : > { %v1024_v37 = vsub.f32 1.0, %v1023_v36  ;;  %vm1048_vm6 = vmor %vm1046_vm4, %vm1047_vm1 }
 0x4f0   : > { %v1043_v22 = vsub.f32 1.0, %v1042_v15 }
 0x4f1   : > { %v1025_v31 = vmul.f32 %v1690_v18, %v1024_v37 }
 0x4f2   : > { %v1044_v49 = vmul.f32 %v1692_v33, %v1043_v22 }
 0x4f3   : > { %v1026_v58 = vadd.f32 %v1690_v18, %v1025_v31 }
 0x4f4   : > { %v1045_v3 = vadd.f32 %v1692_v33, %v1044_v49 }
 0x4f5   : > { %v1030_v34 = vsel %vm1029_vm3, %v1690_v18, %v1026_v58 }
 0x4f6   : > { %v1035_v45 = vsel %vm1032_vm5, %v1034_v42, %v1030_v34  ;;  %v1049_v4 = vsel %vm1048_vm6, %v1692_v33, %v1045_v3 }
 0x4f7   : > { %1509 = vst [vmem:[%s1923_s12 + $0x30] sm:$0xff] %v1035_v45  ;;  %v1054_v8 = vsel %vm1051_vm7, %v1053_v43, %v1049_v4  ;;  %v1058_v12 = vmul.f32 %v1057_v13, %v1035_v45 }
 0x4f8   : > { %1510 = vst [vmem:[%s1925_s13 + $0x30] sm:$0xff] %v1054_v8 }
 0x4f9   : > { %v2380_v14 = vadd.f32 %v1684_v20, %v1058_v12 }
 0x4fb   : > { %1693 = vtanh.f32 %v2380_v14 }
 0x501   : > { %v1694_v23 = vpop.eup %1693 }
 0x502   : > { %v1061_v26 = vmul.f32 %v1694_v23, %v1054_v8 }
 0x504   : > { %v1068_v32 = vpack.c.bf16 %v1061_v26, %v1061_v26 }
 0x506   : > { %1081 = vmatmul.bf16.vlgmr.msrb.gmra.mxu1 %v1068_v32  ;;  %1094 = vmatmul.bf16.vlgmr.msrb.gmra.mxu2 %v1068_v32 }
 0x507   : > { %1107 = vmatmul.bf16.vlgmr.msrb.gmra.mxu3 %v1068_v32 }
 0x583   : > { %v1082_v41 = vpop.f32.mrf.mxu1 }
 0x584   : > { %v1083_v44 = vadd.f32 %v1512_v35, %v1082_v41 }
 0x586   : > { %v1515_v50 = vmul.f32 -1.442695, %v1083_v44 }
 0x588   : > { %1695 = vpow2.f32 %v1515_v50 }
 0x589   : > { %v1095_v62 = vpop.f32.mrf.mxu2 }
 0x58a   : > { %v1096_v5 = vadd.f32 %v1513_v53, %v1095_v62  ;;  %v1108_v10 = vpop.f32.mrf.mxu3 }
 0x58b   : > { %v1109_v46 = vadd.f32 %v1514_v59, %v1108_v10  ;;  %v1084_v47 = vpop.f32.mrf.mxu1 }
 0x58c   : > { %v1516_v48 = vmul.f32 -1.442695, %v1096_v5 }
 0x58d   : > { %1697 = vtanh.f32 %v1109_v46 }
 0x58e   : > { %v1696_v51 = vpop.eup %1695  ;;  %1699 = vpow2.f32 %v1516_v48 }
 0x58f   : > { %v1115_v52 = vadd.f32 1.0, %v1696_v51 }
 0x591   : > { %1701 = vrcp.f32 %v1115_v52  ;;  %v1097_v54 = vpop.f32.mrf.mxu2  ;;  %v1127_v1 = vand.u32 2147483648, %v1115_v52  ;;  %v1125_v6 = vand.u32 2147483647, %v1115_v52  ;;  %vm1121_vm9 = vweird.f32 %v1115_v52 }
 0x592   : > { %v1110_v55 = vpop.f32.mrf.mxu3 }
 0x593   : > { %v1698_v56 = vpop.eup %1697  ;;  %v1128_v16 = vor.u32 1.1754944e-38, %v1127_v1  ;;  %vm1126_vm11 = vcmp.eq.f32.partialorder %v1125_v6, 8.507059e+37 }
 0x594   : > { %v1700_v57 = vpop.eup %1699  ;;  %1519 = vst [vmem:[%s1927_s14 + $0x38] sm:$0xff] %v1698_v56  ;;  %v1151_v20 = vsub.f32 %v2380_v14, %v1698_v56 }
 0x595   : > { %v1134_v60 = vadd.f32 1.0, %v1700_v57 }
 0x597   : > { %v1702_v61 = vpop.eup %1701  ;;  %1703 = vrcp.f32 %v1134_v60  ;;  %v1146_v24 = vand.u32 2147483648, %v1134_v60  ;;  %v1144_v28 = vand.u32 2147483647, %v1134_v60 }
 0x598   : > { %v1117_v63 = vmul.f32 %v1702_v61, %v1115_v52  ;;  %vm1122_vm8 = vweird.f32 %v1702_v61 }
 0x599   : > { %vm1123_vm10 = vmor %vm1121_vm9, %vm1122_vm8 }
 0x59a   : > { %v1118_v0 = vsub.f32 1.0, %v1117_v63 }
 0x59c   : > { %v1119_v2 = vmul.f32 %v1702_v61, %v1118_v0 }
 0x59d   : > { %v1704_v7 = vpop.eup %1703 }
 0x59e   : > { %v1120_v9 = vadd.f32 %v1702_v61, %v1119_v2  ;;  %v1136_v11 = vmul.f32 %v1704_v7, %v1134_v60  ;;  %vm1141_vm12 = vweird.f32 %v1704_v7 }
 0x5a0   : > { %v1124_v17 = vsel %vm1123_vm10, %v1702_v61, %v1120_v9  ;;  %v1137_v19 = vsub.f32 1.0, %v1136_v11 }
 0x5a1   : > { %v1129_v21 = vsel %vm1126_vm11, %v1128_v16, %v1124_v17 }
 0x5a2   : > { %1517 = vst [vmem:[%s1923_s12 + $0x38] sm:$0xff] %v1129_v21  ;;  %v1138_v25 = vmul.f32 %v1704_v7, %v1137_v19  ;;  %v1152_v29 = vmul.f32 %v1151_v20, %v1129_v21  ;;  %s1727_s12 = scalar_lea.hbm %s2504_s2, 256 }
 0x5a3   : > { %p1729_p2 = scmp.lt.s32.totalorder %s1727_s12, %s1723_s0 }
 0x5a5   : > { %p1730_p3 = por %p1729_p2, %p1728_p1 }
 0x5a7   : > { %p1731_p4 = pnand %p1730_p3, %p1726_p0 }
 0x5a9   : > { %1734 = shalt.err (!%p1731_p4)
}
 0x5aa   : > { %s1832_s10 = smov 128   ;;  %s1833_s26 = smov 8   ;;  %v1139_v30 = vadd.f32 %v1704_v7, %v1138_v25  ;;  %vm1140_vm13 = vweird.f32 %v1134_v60  ;;  %v1153_v18 = vadd.f32 %v1698_v56, %v1152_v29  ;;  %v1147_v33 = vor.u32 1.1754944e-38, %v1146_v24 }
 0x5ab   : > { %1559 = dma.vmem_to_hbm [thread:$0]  (%p1904_p5), %s2402_s6, 1024, %s1191_s7, %s1166_s8, %s1832_s10, %s1832_s10, %s1833_s26   ;;  %vm1142_vm14 = vmor %vm1140_vm13, %vm1141_vm12  ;;  %vm1145_vm15 = vcmp.eq.f32.partialorder %v1144_v28, 8.507059e+37 }
 0x5ac   : > { %s2434_s0 = sshll.u32 %s1221_s25, 4  ;;  %s1222_s15 = sshll.u32 %s1927_s14, 4  ;;  %v1143_v36 = vsel %vm1142_vm14, %v1704_v7, %v1139_v30  ;;  %1705 = vtanh.f32 %v1153_v18  ;;  %1163 = vst [vmem:[#allocation3] sm:$0xff] %v1153_v18  ;;  %s1225_s0 = int_to_ptr.hbm [resolvable:$true] %s2434_s0  ;;  %s2440_s15 = int_to_ptr.vmem [resolvable:$true] %s1222_s15 }
 0x5ad   : > { %v1148_v15 = vsel %vm1145_vm15, %v1147_v33, %v1143_v36  ;;  %s2515_s6 = sand.u32 1, %s1885_s22   ;;  %s1749_s25 = sshra.s32 %s1208_s30, 4  ;;  %s1750_s25 = int_to_ptr.hbm [resolvable:$true] %s1749_s25 }
 0x5ae   : > { %1518 = vst [vmem:[%s1925_s13 + $0x38] sm:$0xff] %v1148_v15  ;;  %s2445_s7 = scalar_lea.sflag [#allocation7], %s2515_s6  ;;  %s1751_s14 = scalar_lea.hbm %s1750_s25, 64 }
 0x5af   : > { %p1752_p7 = scmp.ne.s32.totalorder %s1750_s25, %s1751_s14  ;;  %s1755_s16 = scalar_lea.hbm %s2505_s3, 256 }
 0x5b0   : > { %p1756_p10 = scmp.lt.s32.totalorder %s1750_s25, %s2505_s3  ;;  %p1757_p11 = scmp.lt.s32.totalorder %s1755_s16, %s1751_s14 }
 0x5b1   : > { %p1753_p8 = pnand %p1752_p7, %p1904_p5 }
 0x5b2   : > { %p1758_p12 = por %p1757_p11, %p1756_p10 }
 0x5b3   : > { %p1754_p9 = pneg %p1753_p8 }
 0x5b5   : > { %p1759_p13 = pnand %p1758_p12, %p1754_p9 }
 0x5b7   : > { %1762 = shalt.err (!%p1759_p13)
}
 0x5b8   : > { %1560 = dma.vmem_to_hbm [thread:$0]  (%p1904_p5), %s1206_s23, 1024, %s1208_s30, %s2445_s7, %s1832_s10, %s1832_s10, %s1833_s26  }
 0x5b9   : > { %s1777_s22 = sshra.s32 %s1225_s0, 4  ;;  %s1783_s25 = scalar_lea.hbm %s2506_s4, 256  ;;  %s1778_s22 = int_to_ptr.hbm [resolvable:$true] %s1777_s22 }
 0x5ba   : > { %s1779_s13 = scalar_lea.hbm %s1778_s22, 64  ;;  %p1784_p3 = scmp.lt.s32.totalorder %s1778_s22, %s2506_s4 }
 0x5bb   : > { %p1780_p0 = scmp.ne.s32.totalorder %s1778_s22, %s1779_s13  ;;  %p1785_p4 = scmp.lt.s32.totalorder %s1783_s25, %s1779_s13 }
 0x5bd   : > { %p1781_p1 = pnand %p1780_p0, %p1904_p5  ;;  %p1786_p7 = por %p1785_p4, %p1784_p3 }
 0x5bf   : > { %p1782_p2 = pneg %p1781_p1 }
 0x5c1   : > { %p1787_p8 = pnand %p1786_p7, %p1782_p2 }
 0x5c3   : > { %1790 = shalt.err (!%p1787_p8)
}
 0x5c4   : > { %1561 = dma.vmem_to_hbm [thread:$0]  (%p1904_p5), %s2440_s15, 1024, %s1225_s0, %s2445_s7, %s1832_s10, %s1832_s10, %s1833_s26   ;;  %v1706_v37 = vpop.eup %1705 }
 0x5c5   : > { %v1155_v38 = vmul.f32 %v1706_v37, %v1148_v15 }
 0x5c7   : > { %1162 = vst [vmem:[#allocation2] sm:$0xff] %v1155_v38 }
 0x5c8   : > { %1164 = vst [vmem:[%s2507_s5] sm:$0xff] %v1155_v38 }
 0x5c9 PF: > { %p1575_p9 = scmp.ge.s32.totalorder %s1829_s21, 2  ;;  %s1245_s28 = sand.u32 1, %s1817_s18  }
 0x5ca   : > { %s1246_s9 = scalar_lea.sflag [#allocation5], %s1245_s28 }
 0x5cb   : > { %p1566_p10 = pnand %p1575_p9, %p1908_p6 }
 0x5cd   : > { %p1567_p11 = pneg %p1566_p10 }
 0x5cf   : > { %1808 = dma.done.wait (%p1567_p11), %s1246_s9, 1024  }
 0x5d0   : > { %1810 = vsyncadd (%p1567_p11), %s1246_s9, 4294966272  ;;  %s2516_s10 = sadd.s32 4294967294, %s1829_s21  }
 0x5d1   : > { %s1255_s26 = sand.u32 1, %s2516_s10  }
 0x5d2   : > { %s1256_s0 = scalar_lea.sflag [#allocation7], %s1255_s26 }
 0x5d3   : > { %1812 = dma.done.wait (%p1567_p11), %s1256_s0, 2048  }
 0x5d4   : > { %1814 = vsyncadd (%p1567_p11), %s1256_s0, 4294965248  ;;  %p19_p5 = scmp.ge.s32.totalorder %s1889_s24, 6   ;;  %s2517_s18 = smov %s1821_s19 }
 0x5d5   : > { %s2518_s19 = smov %s1825_s20  ;;  %s2519_s20 = smov %s1902_s27 }
 0x5d6   : > { %s2520_s21 = smov %s1889_s24  ;;  %21 = sbr.rel (!%p19_p5) target bundleno = 7 (0x7), region = 135 }
 0x5db   :  { %1272 = vsyncpa [#allocation5], 1 }
 0x5dc   :  { %1274 = vsyncpa [#allocation5 + $0x1], 1 }
 0x5dd   :  { %1275 = vsyncpa [#allocation7], 1 }
 0x5de   :  { %1277 = vsyncpa [#allocation7 + $0x1], 1 }

</bundles_post_ra>
